<compile_context>
chip_gen: v7x
topology: tpu7x:2x2x1
jax: 0.10.0
libtpu: 0.0.40
codegen_flags: <defaults>
</compile_context>

<pallas_src>
import jax
import jax.numpy as jnp
import numpy as np
from jax import lax
from jax.experimental import pallas as pl
from jax.experimental.pallas import tpu as pltpu


def _bottleneck_kernel(x_ref, w1_ref, b1_ref, w2_ref, b2_ref, w3_ref, b3_ref,
                       out_ref, pad_ref):
    H, W, Cin = x_ref.shape
    Cp = w1_ref.shape[1]            # lane-padded bottleneck width (mult. of 128)
    Cout = w3_ref.shape[1]
    P = H * W
    mm_dtype = w1_ref.dtype         # bf16 MXU operand dtype

    # ---- single load of x: conv1 operand AND (f32) residual identity -------
    x = x_ref[...].reshape(P, Cin)

    # ---- conv1 (1x1) + folded-BN bias + ReLU, one cast to MXU dtype --------
    y1 = jnp.dot(x.astype(mm_dtype), w1_ref[...],
                 preferred_element_type=jnp.float32)
    y1 = jnp.maximum(y1 + b1_ref[...], 0.0).astype(mm_dtype)   # (P, Cp) bf16

    # ---- stage y1 into the zero-padded bf16 per-image scratch --------------
    # Scratch persists across grid steps, so the 1-pixel border is re-zeroed
    # every step (gating on program_id would break under megacore splitting).
    pad_ref[0:1, :, :] = jnp.zeros((1, W + 2, Cp), mm_dtype)
    pad_ref[H + 1:H + 2, :, :] = jnp.zeros((1, W + 2, Cp), mm_dtype)
    pad_ref[1:H + 1, 0:1, :] = jnp.zeros((H, 1, Cp), mm_dtype)
    pad_ref[1:H + 1, W + 1:W + 2, :] = jnp.zeros((H, 1, Cp), mm_dtype)
    pad_ref[1:H + 1, 1:W + 1, :] = y1.reshape(H, W, Cp)

    # ---- conv2 (3x3, stride 1, pad 1): 9 accumulating K=Cp matmuls ---------
    y2 = jnp.zeros((P, Cp), jnp.float32)
    t = 0
    for dy in range(3):
        for dx in range(3):
            tap = pad_ref[dy:dy + H, dx:dx + W, :].reshape(P, Cp)   # bf16
            y2 = y2 + jnp.dot(tap, w2_ref[t * Cp:(t + 1) * Cp, :],
                              preferred_element_type=jnp.float32)
            t += 1
    y2 = jnp.maximum(y2 + b2_ref[...], 0.0).astype(mm_dtype)        # (P, Cp)

    # ---- conv3 (1x1) + folded-BN bias + residual add + ReLU ----------------
    y3 = jnp.dot(y2, w3_ref[...], preferred_element_type=jnp.float32)
    out = jnp.maximum(y3 + b3_ref[...] + x, 0.0)                    # f32
    out_ref[...] = out.reshape(H, W, Cout).astype(out_ref.dtype)


def bottleneck_forward(x, w1, s1, b1, w2, s2, b2, w3, s3, b3, *,
                       matmul_dtype=jnp.bfloat16, out_dtype=jnp.float32,
                       vmem_limit_bytes=40 * 1024 * 1024):
    """Bottleneck forward in NHWC (stride=1, dilation=1, no downsample).

    x : (N, H, W, Cin) f32
    w1: (Cin, Cmid)    w2: (3, 3, Cmid, Cmid) HWIO    w3: (Cmid, Cout)
    s*/b*: per-channel inference BatchNorm scale / bias (folded here).
    Matmuls run with bf16 operands / f32 accumulation (inference-grade,
    ~1e-2 relative error vs full f32).
    """
    N, H, W, Cin = x.shape
    Cmid = w1.shape[1]
    Cout = w3.shape[1]
    assert Cin == Cout, "identity residual needs inplanes == planes * expansion"

    # Lane-pad the bottleneck width so intermediates are 128-dense.
    Cp = ((Cmid + 127) // 128) * 128

    # Fold BN scales into the conv weights, then zero-pad Cmid -> Cp.
    w1f = (w1 * s1[None, :]).astype(matmul_dtype)
    w2f = (w2 * s2[None, None, None, :]).astype(matmul_dtype)
    w3f = (w3 * s3[None, :]).astype(matmul_dtype)

    w1p = jnp.zeros((Cin, Cp), matmul_dtype).at[:, :Cmid].set(w1f)
    w2p = jnp.zeros((3, 3, Cp, Cp), matmul_dtype).at[:, :, :Cmid, :Cmid].set(w2f)
    w2p = w2p.reshape(9 * Cp, Cp)                       # (dy, dx, ci) row order
    w3p = jnp.zeros((Cp, Cout), matmul_dtype).at[:Cmid, :].set(w3f)

    b1p = jnp.zeros((1, Cp), jnp.float32).at[0, :Cmid].set(b1.astype(jnp.float32))
    b2p = jnp.zeros((1, Cp), jnp.float32).at[0, :Cmid].set(b2.astype(jnp.float32))
    b3r = b3.reshape(1, Cout).astype(jnp.float32)

    # Weights / biases: whole array resident in VMEM, single-buffered
    # (constant across grid steps -> no need for pipelined double-buffering).
    def vmem_full():
        return pl.BlockSpec(memory_space=pltpu.MemorySpace.VMEM)

    return pl.pallas_call(
        _bottleneck_kernel,
        out_shape=jax.ShapeDtypeStruct((N, H, W, Cout), out_dtype),
        grid=(N,),
        in_specs=[
            pl.BlockSpec((None, H, W, Cin), lambda n: (n, 0, 0, 0)),
            vmem_full(), vmem_full(), vmem_full(),
            vmem_full(), vmem_full(), vmem_full(),
        ],
        out_specs=pl.BlockSpec((None, H, W, Cout), lambda n: (n, 0, 0, 0)),
        scratch_shapes=[pltpu.VMEM((H + 2, W + 2, Cp), matmul_dtype)],
        compiler_params=pltpu.CompilerParams(
            dimension_semantics=("parallel",),
            vmem_limit_bytes=vmem_limit_bytes),
    )(x, w1p, b1p, w2p, b2p, w3p, b3r)


# ------------------------- reference (plain JAX, f32) ------------------------
def _ref_forward(x, w1, s1, b1, w2, s2, b2, w3, s3, b3):
    dn = ('NHWC', 'HWIO', 'NHWC')
    Cin = x.shape[-1]
    Cmid = w1.shape[1]
    y = lax.conv_general_dilated(x, w1.reshape(1, 1, Cin, Cmid), (1, 1), 'VALID',
                                 dimension_numbers=dn)
    y = jnp.maximum(y * s1 + b1, 0.0)
    y = lax.conv_general_dilated(y, w2, (1, 1), ((1, 1), (1, 1)),
                                 dimension_numbers=dn)
    y = jnp.maximum(y * s2 + b2, 0.0)
    y = lax.conv_general_dilated(y, w3.reshape(1, 1, Cmid, w3.shape[1]), (1, 1),
                                 'VALID', dimension_numbers=dn)
    y = y * s3 + b3
    return jnp.maximum(y + x, 0.0)


def _fold_bn(gamma, beta, mean, var, eps=1e-5):
    scale = gamma / jnp.sqrt(var + eps)
    bias = beta - mean * scale
    return scale, bias


if __name__ == "__main__":
    # planes=8, expansion=4 -> inplanes = cout = 32 (required when downsample=None).
    N, H, W = 2, 8, 8
    planes = 8
    inplanes = planes * 4   # 32
    cout = planes * 4       # 32

    key = jax.random.PRNGKey(0)
    ks = jax.random.split(key, 8)

    x = jax.random.normal(ks[0], (N, H, W, inplanes), jnp.float32)
    w1 = jax.random.normal(ks[1], (inplanes, planes), jnp.float32) * 0.1
    w2 = jax.random.normal(ks[2], (3, 3, planes, planes), jnp.float32) * 0.1
    w3 = jax.random.normal(ks[3], (planes, cout), jnp.float32) * 0.1

    def bn_params(k, c):
        k1, k2, k3, k4 = jax.random.split(k, 4)
        gamma = 1.0 + 0.1 * jax.random.normal(k1, (c,), jnp.float32)
        beta = 0.1 * jax.random.normal(k2, (c,), jnp.float32)
        mean = 0.1 * jax.random.normal(k3, (c,), jnp.float32)
        var = jax.random.uniform(k4, (c,), jnp.float32, 0.5, 1.5)
        return _fold_bn(gamma, beta, mean, var)

    s1, b1 = bn_params(ks[4], planes)
    s2, b2 = bn_params(ks[5], planes)
    s3, b3 = bn_params(ks[6], cout)

    args = (x, w1, s1, b1, w2, s2, b2, w3, s3, b3)
    out = jax.block_until_ready(bottleneck_forward(*args))

    ref = _ref_forward(*args)
    # bf16 MXU operands (f32 accumulation / epilogue) vs. full-f32 reference.
    np.testing.assert_allclose(np.asarray(out), np.asarray(ref),
                               rtol=2e-2, atol=2e-2)
    print("KERNEL_OK")
</pallas_src>

<mosaic_0001>
module attributes {stable_mosaic.version = 11 : i64} {
  func.func @_bottleneck_kernel(%arg0: i32, %arg1: memref<1x8x8x32xf32, #tpu.memory_space<vmem>>, %arg2: memref<32x128xbf16, #tpu.memory_space<vmem>>, %arg3: memref<1x128xf32, #tpu.memory_space<vmem>>, %arg4: memref<1152x128xbf16, #tpu.memory_space<vmem>>, %arg5: memref<1x128xf32, #tpu.memory_space<vmem>>, %arg6: memref<128x32xbf16, #tpu.memory_space<vmem>>, %arg7: memref<1x32xf32, #tpu.memory_space<vmem>>, %arg8: memref<1x8x8x32xf32, #tpu.memory_space<vmem>>, %arg9: memref<10x10x128xbf16, #tpu.memory_space<vmem>>) attributes {dimension_semantics = [#tpu.dimension_semantics<parallel>], iteration_bounds = array<i64: 2>, scalar_prefetch = 0 : i64, scratch_operands = 1 : i64, tpu.core_type = #tpu.core_type<tc>, window_params = [{transform_indices = @transform_0, window_bounds = array<i64: 1, 8, 8, 32>}, {pipeline_mode = #tpu.pipeline_mode<synchronous>, transform_indices = @transform_1, window_bounds = array<i64: 32, 128>}, {pipeline_mode = #tpu.pipeline_mode<synchronous>, transform_indices = @transform_2, window_bounds = array<i64: 1, 128>}, {pipeline_mode = #tpu.pipeline_mode<synchronous>, transform_indices = @transform_3, window_bounds = array<i64: 1152, 128>}, {pipeline_mode = #tpu.pipeline_mode<synchronous>, transform_indices = @transform_4, window_bounds = array<i64: 1, 128>}, {pipeline_mode = #tpu.pipeline_mode<synchronous>, transform_indices = @transform_5, window_bounds = array<i64: 128, 32>}, {pipeline_mode = #tpu.pipeline_mode<synchronous>, transform_indices = @transform_6, window_bounds = array<i64: 1, 32>}, {transform_indices = @transform_7, window_bounds = array<i64: 1, 8, 8, 32>}]} {
    %c0 = arith.constant 0 : index
    %c0_0 = arith.constant 0 : index
    %c0_1 = arith.constant 0 : index
    %c0_2 = arith.constant 0 : index
    %0 = vector.load %arg1[%c0, %c0_0, %c0_1, %c0_2] : memref<1x8x8x32xf32, #tpu.memory_space<vmem>>, vector<1x8x8x32xf32>
    %1 = vector.shape_cast %0 : vector<1x8x8x32xf32> to vector<8x8x32xf32>
    %2 = vector.shape_cast %1 : vector<8x8x32xf32> to vector<64x32xf32>
    %3 = arith.truncf %2 : vector<64x32xf32> to vector<64x32xbf16>
    %c0_3 = arith.constant 0 : index
    %c0_4 = arith.constant 0 : index
    %4 = vector.load %arg2[%c0_3, %c0_4] : memref<32x128xbf16, #tpu.memory_space<vmem>>, vector<32x128xbf16>
    %cst = arith.constant dense<0.000000e+00> : vector<64x128xf32>
    %5 = tpu.matmul %3, %4, %cst {dimension_numbers = #tpu.dot_dimension_numbers<[1], [0], [0], [1], [0, 0, 1, 1], [], []>} : vector<64x32xbf16>, vector<32x128xbf16>, vector<64x128xf32> -> vector<64x128xf32>
    %c0_5 = arith.constant 0 : index
    %c0_6 = arith.constant 0 : index
    %6 = vector.load %arg3[%c0_5, %c0_6] : memref<1x128xf32, #tpu.memory_space<vmem>>, vector<1x128xf32>
    %7 = vector.broadcast %6 : vector<1x128xf32> to vector<64x128xf32>
    %8 = arith.addf %5, %7 : vector<64x128xf32>
    %cst_7 = arith.constant 0.000000e+00 : f32
    %9 = vector.broadcast %cst_7 : f32 to vector<64x128xf32>
    %10 = arith.maximumf %8, %9 : vector<64x128xf32>
    %11 = arith.truncf %10 : vector<64x128xf32> to vector<64x128xbf16>
    %cst_8 = arith.constant 0.000000e+00 : bf16
    %12 = vector.broadcast %cst_8 : bf16 to vector<1x10x128xbf16>
    %c0_9 = arith.constant 0 : index
    %c0_10 = arith.constant 0 : index
    %c0_11 = arith.constant 0 : index
    %13 = vector.load %arg9[%c0_9, %c0_10, %c0_11] : memref<10x10x128xbf16, #tpu.memory_space<vmem>>, vector<1x10x128xbf16>
    tpu.vector_store %arg9[%c0_9, %c0_10, %c0_11], %12 {strides = array<i32>} : memref<10x10x128xbf16, #tpu.memory_space<vmem>>, vector<1x10x128xbf16>,
    %cst_12 = arith.constant 0.000000e+00 : bf16
    %14 = vector.broadcast %cst_12 : bf16 to vector<1x10x128xbf16>
    %c9 = arith.constant 9 : index
    %c0_13 = arith.constant 0 : index
    %c0_14 = arith.constant 0 : index
    %15 = vector.load %arg9[%c9, %c0_13, %c0_14] : memref<10x10x128xbf16, #tpu.memory_space<vmem>>, vector<1x10x128xbf16>
    tpu.vector_store %arg9[%c9, %c0_13, %c0_14], %14 {strides = array<i32>} : memref<10x10x128xbf16, #tpu.memory_space<vmem>>, vector<1x10x128xbf16>,
    %cst_15 = arith.constant 0.000000e+00 : bf16
    %16 = vector.broadcast %cst_15 : bf16 to vector<8x1x128xbf16>
    %c1 = arith.constant 1 : index
    %c0_16 = arith.constant 0 : index
    %c0_17 = arith.constant 0 : index
    %17 = vector.load %arg9[%c1, %c0_16, %c0_17] : memref<10x10x128xbf16, #tpu.memory_space<vmem>>, vector<8x1x128xbf16>
    tpu.vector_store %arg9[%c1, %c0_16, %c0_17], %16 {strides = array<i32>} : memref<10x10x128xbf16, #tpu.memory_space<vmem>>, vector<8x1x128xbf16>,
    %cst_18 = arith.constant 0.000000e+00 : bf16
    %18 = vector.broadcast %cst_18 : bf16 to vector<8x1x128xbf16>
    %c1_19 = arith.constant 1 : index
    %c9_20 = arith.constant 9 : index
    %c0_21 = arith.constant 0 : index
    %19 = vector.load %arg9[%c1_19, %c9_20, %c0_21] : memref<10x10x128xbf16, #tpu.memory_space<vmem>>, vector<8x1x128xbf16>
    tpu.vector_store %arg9[%c1_19, %c9_20, %c0_21], %18 {strides = array<i32>} : memref<10x10x128xbf16, #tpu.memory_space<vmem>>, vector<8x1x128xbf16>,
    %20 = vector.shape_cast %11 : vector<64x128xbf16> to vector<8x8x128xbf16>
    %c1_22 = arith.constant 1 : index
    %c1_23 = arith.constant 1 : index
    %c0_24 = arith.constant 0 : index
    %21 = vector.load %arg9[%c1_22, %c1_23, %c0_24] : memref<10x10x128xbf16, #tpu.memory_space<vmem>>, vector<8x8x128xbf16>
    tpu.vector_store %arg9[%c1_22, %c1_23, %c0_24], %20 {strides = array<i32>} : memref<10x10x128xbf16, #tpu.memory_space<vmem>>, vector<8x8x128xbf16>,
    %cst_25 = arith.constant 0.000000e+00 : f32
    %22 = vector.broadcast %cst_25 : f32 to vector<64x128xf32>
    %c0_26 = arith.constant 0 : index
    %c0_27 = arith.constant 0 : index
    %c0_28 = arith.constant 0 : index
    %23 = vector.load %arg9[%c0_26, %c0_27, %c0_28] : memref<10x10x128xbf16, #tpu.memory_space<vmem>>, vector<8x8x128xbf16>
    %24 = vector.shape_cast %23 : vector<8x8x128xbf16> to vector<64x128xbf16>
    %c0_29 = arith.constant 0 : index
    %c0_30 = arith.constant 0 : index
    %25 = vector.load %arg4[%c0_29, %c0_30] : memref<1152x128xbf16, #tpu.memory_space<vmem>>, vector<128x128xbf16>
    %cst_31 = arith.constant dense<0.000000e+00> : vector<64x128xf32>
    %26 = tpu.matmul %24, %25, %cst_31 {dimension_numbers = #tpu.dot_dimension_numbers<[1], [0], [0], [1], [0, 0, 1, 1], [], []>} : vector<64x128xbf16>, vector<128x128xbf16>, vector<64x128xf32> -> vector<64x128xf32>
    %27 = arith.addf %22, %26 : vector<64x128xf32>
    %c0_32 = arith.constant 0 : index
    %c1_33 = arith.constant 1 : index
    %c0_34 = arith.constant 0 : index
    %28 = vector.load %arg9[%c0_32, %c1_33, %c0_34] : memref<10x10x128xbf16, #tpu.memory_space<vmem>>, vector<8x8x128xbf16>
    %29 = vector.shape_cast %28 : vector<8x8x128xbf16> to vector<64x128xbf16>
    %c128 = arith.constant 128 : index
    %c0_35 = arith.constant 0 : index
    %30 = vector.load %arg4[%c128, %c0_35] : memref<1152x128xbf16, #tpu.memory_space<vmem>>, vector<128x128xbf16>
    %cst_36 = arith.constant dense<0.000000e+00> : vector<64x128xf32>
    %31 = tpu.matmul %29, %30, %cst_36 {dimension_numbers = #tpu.dot_dimension_numbers<[1], [0], [0], [1], [0, 0, 1, 1], [], []>} : vector<64x128xbf16>, vector<128x128xbf16>, vector<64x128xf32> -> vector<64x128xf32>
    %32 = arith.addf %27, %31 : vector<64x128xf32>
    %c0_37 = arith.constant 0 : index
    %c2 = arith.constant 2 : index
    %c0_38 = arith.constant 0 : index
    %33 = vector.load %arg9[%c0_37, %c2, %c0_38] : memref<10x10x128xbf16, #tpu.memory_space<vmem>>, vector<8x8x128xbf16>
    %34 = vector.shape_cast %33 : vector<8x8x128xbf16> to vector<64x128xbf16>
    %c256 = arith.constant 256 : index
    %c0_39 = arith.constant 0 : index
    %35 = vector.load %arg4[%c256, %c0_39] : memref<1152x128xbf16, #tpu.memory_space<vmem>>, vector<128x128xbf16>
    %cst_40 = arith.constant dense<0.000000e+00> : vector<64x128xf32>
    %36 = tpu.matmul %34, %35, %cst_40 {dimension_numbers = #tpu.dot_dimension_numbers<[1], [0], [0], [1], [0, 0, 1, 1], [], []>} : vector<64x128xbf16>, vector<128x128xbf16>, vector<64x128xf32> -> vector<64x128xf32>
    %37 = arith.addf %32, %36 : vector<64x128xf32>
    %c1_41 = arith.constant 1 : index
    %c0_42 = arith.constant 0 : index
    %c0_43 = arith.constant 0 : index
    %38 = vector.load %arg9[%c1_41, %c0_42, %c0_43] : memref<10x10x128xbf16, #tpu.memory_space<vmem>>, vector<8x8x128xbf16>
    %39 = vector.shape_cast %38 : vector<8x8x128xbf16> to vector<64x128xbf16>
    %c384 = arith.constant 384 : index
    %c0_44 = arith.constant 0 : index
    %40 = vector.load %arg4[%c384, %c0_44] : memref<1152x128xbf16, #tpu.memory_space<vmem>>, vector<128x128xbf16>
    %cst_45 = arith.constant dense<0.000000e+00> : vector<64x128xf32>
    %41 = tpu.matmul %39, %40, %cst_45 {dimension_numbers = #tpu.dot_dimension_numbers<[1], [0], [0], [1], [0, 0, 1, 1], [], []>} : vector<64x128xbf16>, vector<128x128xbf16>, vector<64x128xf32> -> vector<64x128xf32>
    %42 = arith.addf %37, %41 : vector<64x128xf32>
    %c1_46 = arith.constant 1 : index
    %c1_47 = arith.constant 1 : index
    %c0_48 = arith.constant 0 : index
    %43 = vector.load %arg9[%c1_46, %c1_47, %c0_48] : memref<10x10x128xbf16, #tpu.memory_space<vmem>>, vector<8x8x128xbf16>
    %44 = vector.shape_cast %43 : vector<8x8x128xbf16> to vector<64x128xbf16>
    %c512 = arith.constant 512 : index
    %c0_49 = arith.constant 0 : index
    %45 = vector.load %arg4[%c512, %c0_49] : memref<1152x128xbf16, #tpu.memory_space<vmem>>, vector<128x128xbf16>
    %cst_50 = arith.constant dense<0.000000e+00> : vector<64x128xf32>
    %46 = tpu.matmul %44, %45, %cst_50 {dimension_numbers = #tpu.dot_dimension_numbers<[1], [0], [0], [1], [0, 0, 1, 1], [], []>} : vector<64x128xbf16>, vector<128x128xbf16>, vector<64x128xf32> -> vector<64x128xf32>
    %47 = arith.addf %42, %46 : vector<64x128xf32>
    %c1_51 = arith.constant 1 : index
    %c2_52 = arith.constant 2 : index
    %c0_53 = arith.constant 0 : index
    %48 = vector.load %arg9[%c1_51, %c2_52, %c0_53] : memref<10x10x128xbf16, #tpu.memory_space<vmem>>, vector<8x8x128xbf16>
    %49 = vector.shape_cast %48 : vector<8x8x128xbf16> to vector<64x128xbf16>
    %c640 = arith.constant 640 : index
    %c0_54 = arith.constant 0 : index
    %50 = vector.load %arg4[%c640, %c0_54] : memref<1152x128xbf16, #tpu.memory_space<vmem>>, vector<128x128xbf16>
    %cst_55 = arith.constant dense<0.000000e+00> : vector<64x128xf32>
    %51 = tpu.matmul %49, %50, %cst_55 {dimension_numbers = #tpu.dot_dimension_numbers<[1], [0], [0], [1], [0, 0, 1, 1], [], []>} : vector<64x128xbf16>, vector<128x128xbf16>, vector<64x128xf32> -> vector<64x128xf32>
    %52 = arith.addf %47, %51 : vector<64x128xf32>
    %c2_56 = arith.constant 2 : index
    %c0_57 = arith.constant 0 : index
    %c0_58 = arith.constant 0 : index
    %53 = vector.load %arg9[%c2_56, %c0_57, %c0_58] : memref<10x10x128xbf16, #tpu.memory_space<vmem>>, vector<8x8x128xbf16>
    %54 = vector.shape_cast %53 : vector<8x8x128xbf16> to vector<64x128xbf16>
    %c768 = arith.constant 768 : index
    %c0_59 = arith.constant 0 : index
    %55 = vector.load %arg4[%c768, %c0_59] : memref<1152x128xbf16, #tpu.memory_space<vmem>>, vector<128x128xbf16>
    %cst_60 = arith.constant dense<0.000000e+00> : vector<64x128xf32>
    %56 = tpu.matmul %54, %55, %cst_60 {dimension_numbers = #tpu.dot_dimension_numbers<[1], [0], [0], [1], [0, 0, 1, 1], [], []>} : vector<64x128xbf16>, vector<128x128xbf16>, vector<64x128xf32> -> vector<64x128xf32>
    %57 = arith.addf %52, %56 : vector<64x128xf32>
    %c2_61 = arith.constant 2 : index
    %c1_62 = arith.constant 1 : index
    %c0_63 = arith.constant 0 : index
    %58 = vector.load %arg9[%c2_61, %c1_62, %c0_63] : memref<10x10x128xbf16, #tpu.memory_space<vmem>>, vector<8x8x128xbf16>
    %59 = vector.shape_cast %58 : vector<8x8x128xbf16> to vector<64x128xbf16>
    %c896 = arith.constant 896 : index
    %c0_64 = arith.constant 0 : index
    %60 = vector.load %arg4[%c896, %c0_64] : memref<1152x128xbf16, #tpu.memory_space<vmem>>, vector<128x128xbf16>
    %cst_65 = arith.constant dense<0.000000e+00> : vector<64x128xf32>
    %61 = tpu.matmul %59, %60, %cst_65 {dimension_numbers = #tpu.dot_dimension_numbers<[1], [0], [0], [1], [0, 0, 1, 1], [], []>} : vector<64x128xbf16>, vector<128x128xbf16>, vector<64x128xf32> -> vector<64x128xf32>
    %62 = arith.addf %57, %61 : vector<64x128xf32>
    %c2_66 = arith.constant 2 : index
    %c2_67 = arith.constant 2 : index
    %c0_68 = arith.constant 0 : index
    %63 = vector.load %arg9[%c2_66, %c2_67, %c0_68] : memref<10x10x128xbf16, #tpu.memory_space<vmem>>, vector<8x8x128xbf16>
    %64 = vector.shape_cast %63 : vector<8x8x128xbf16> to vector<64x128xbf16>
    %c1024 = arith.constant 1024 : index
    %c0_69 = arith.constant 0 : index
    %65 = vector.load %arg4[%c1024, %c0_69] : memref<1152x128xbf16, #tpu.memory_space<vmem>>, vector<128x128xbf16>
    %cst_70 = arith.constant dense<0.000000e+00> : vector<64x128xf32>
    %66 = tpu.matmul %64, %65, %cst_70 {dimension_numbers = #tpu.dot_dimension_numbers<[1], [0], [0], [1], [0, 0, 1, 1], [], []>} : vector<64x128xbf16>, vector<128x128xbf16>, vector<64x128xf32> -> vector<64x128xf32>
    %67 = arith.addf %62, %66 : vector<64x128xf32>
    %c0_71 = arith.constant 0 : index
    %c0_72 = arith.constant 0 : index
    %68 = vector.load %arg5[%c0_71, %c0_72] : memref<1x128xf32, #tpu.memory_space<vmem>>, vector<1x128xf32>
    %69 = vector.broadcast %68 : vector<1x128xf32> to vector<64x128xf32>
    %70 = arith.addf %67, %69 : vector<64x128xf32>
    %cst_73 = arith.constant 0.000000e+00 : f32
    %71 = vector.broadcast %cst_73 : f32 to vector<64x128xf32>
    %72 = arith.maximumf %70, %71 : vector<64x128xf32>
    %73 = arith.truncf %72 : vector<64x128xf32> to vector<64x128xbf16>
    %c0_74 = arith.constant 0 : index
    %c0_75 = arith.constant 0 : index
    %74 = vector.load %arg6[%c0_74, %c0_75] : memref<128x32xbf16, #tpu.memory_space<vmem>>, vector<128x32xbf16>
    %cst_76 = arith.constant dense<0.000000e+00> : vector<64x32xf32>
    %75 = tpu.matmul %73, %74, %cst_76 {dimension_numbers = #tpu.dot_dimension_numbers<[1], [0], [0], [1], [0, 0, 1, 1], [], []>} : vector<64x128xbf16>, vector<128x32xbf16>, vector<64x32xf32> -> vector<64x32xf32>
    %c0_77 = arith.constant 0 : index
    %c0_78 = arith.constant 0 : index
    %76 = vector.load %arg7[%c0_77, %c0_78] : memref<1x32xf32, #tpu.memory_space<vmem>>, vector<1x32xf32>
    %77 = vector.broadcast %76 : vector<1x32xf32> to vector<64x32xf32>
    %78 = arith.addf %75, %77 : vector<64x32xf32>
    %79 = arith.addf %78, %2 : vector<64x32xf32>
    %cst_79 = arith.constant 0.000000e+00 : f32
    %80 = vector.broadcast %cst_79 : f32 to vector<64x32xf32>
    %81 = arith.maximumf %79, %80 : vector<64x32xf32>
    %82 = vector.shape_cast %81 : vector<64x32xf32> to vector<8x8x32xf32>
    %c0_80 = arith.constant 0 : index
    %c0_81 = arith.constant 0 : index
    %c0_82 = arith.constant 0 : index
    %c0_83 = arith.constant 0 : index
    %83 = vector.load %arg8[%c0_80, %c0_81, %c0_82, %c0_83] : memref<1x8x8x32xf32, #tpu.memory_space<vmem>>, vector<1x8x8x32xf32>
    %84 = vector.shape_cast %83 : vector<1x8x8x32xf32> to vector<8x8x32xf32>
    %85 = vector.shape_cast %82 : vector<8x8x32xf32> to vector<1x8x8x32xf32>
    tpu.vector_store %arg8[%c0_80, %c0_81, %c0_82, %c0_83], %85 {strides = array<i32>} : memref<1x8x8x32xf32, #tpu.memory_space<vmem>>, vector<1x8x8x32xf32>,
    return
  }
  func.func @transform_0(%arg0: i32) -> (i32, i32, i32, i32) {
    %c0_i32 = arith.constant 0 : i32
    %c0_i32_0 = arith.constant 0 : i32
    %c0_i32_1 = arith.constant 0 : i32
    %c0_i32_2 = arith.constant 0 : i32
    return %arg0, %c0_i32, %c0_i32_0, %c0_i32_1 : i32, i32, i32, i32
  }
  func.func @transform_1(%arg0: i32) -> (i32, i32) {
    %c0_i32 = arith.constant 0 : i32
    %c0_i32_0 = arith.constant 0 : i32
    %c0_i32_1 = arith.constant 0 : i32
    return %c0_i32, %c0_i32_0 : i32, i32
  }
  func.func @transform_2(%arg0: i32) -> (i32, i32) {
    %c0_i32 = arith.constant 0 : i32
    %c0_i32_0 = arith.constant 0 : i32
    %c0_i32_1 = arith.constant 0 : i32
    return %c0_i32, %c0_i32_0 : i32, i32
  }
  func.func @transform_3(%arg0: i32) -> (i32, i32) {
    %c0_i32 = arith.constant 0 : i32
    %c0_i32_0 = arith.constant 0 : i32
    %c0_i32_1 = arith.constant 0 : i32
    return %c0_i32, %c0_i32_0 : i32, i32
  }
  func.func @transform_4(%arg0: i32) -> (i32, i32) {
    %c0_i32 = arith.constant 0 : i32
    %c0_i32_0 = arith.constant 0 : i32
    %c0_i32_1 = arith.constant 0 : i32
    return %c0_i32, %c0_i32_0 : i32, i32
  }
  func.func @transform_5(%arg0: i32) -> (i32, i32) {
    %c0_i32 = arith.constant 0 : i32
    %c0_i32_0 = arith.constant 0 : i32
    %c0_i32_1 = arith.constant 0 : i32
    return %c0_i32, %c0_i32_0 : i32, i32
  }
  func.func @transform_6(%arg0: i32) -> (i32, i32) {
    %c0_i32 = arith.constant 0 : i32
    %c0_i32_0 = arith.constant 0 : i32
    %c0_i32_1 = arith.constant 0 : i32
    return %c0_i32, %c0_i32_0 : i32, i32
  }
  func.func @transform_7(%arg0: i32) -> (i32, i32, i32, i32) {
    %c0_i32 = arith.constant 0 : i32
    %c0_i32_0 = arith.constant 0 : i32
    %c0_i32_1 = arith.constant 0 : i32
    %c0_i32_2 = arith.constant 0 : i32
    return %arg0, %c0_i32, %c0_i32_0, %c0_i32_1 : i32, i32, i32, i32
  }
}

</mosaic_0001>

<bundles_post_ra>
// kernel: tpu_custom_call.1
= control target key start
LH: loop header
LB: loop body
LE: loop exit
PB: predicated region body
PF: predicated region fallthrough
CT: control target
= control target key end

     0   :  { %12 = vsyncpa [#allocation4], 0  ;;  %s4508_s0 = inlined_call_operand.hbm [shape: f32[2,8,8,32], index: 0, kind: input, shape index: {}]   ;;  %s4509_s1 = inlined_call_operand.vmem [shape: bf16[32,128], index: 1, kind: input, shape index: {}]   ;;  %s4510_s2 = inlined_call_operand.vmem [shape: f32[1,128], index: 2, kind: input, shape index: {}]   ;;  %s4511_s3 = inlined_call_operand.hbm [shape: bf16[1152,128], index: 3, kind: input, shape index: {}]   ;;  %s4512_s4 = inlined_call_operand.vmem [shape: f32[1,128], index: 4, kind: input, shape index: {}]   ;;  %s4513_s5 = inlined_call_operand.vmem [shape: bf16[128,32], index: 5, kind: input, shape index: {}]   ;;  %s4514_s6 = inlined_call_operand.vmem [shape: f32[1,32], index: 6, kind: input, shape index: {}]   ;;  %s4515_s7 = inlined_call_operand.hbm [shape: f32[2,8,8,32], index: 7, kind: output, shape index: {}]  }
   0x1   :  { %14 = vsyncpa [#allocation4 + $0x1], 0 }
   0x2   :  { %15 = vsyncpa [#allocation7], 0 }
   0x3   :  { %16 = vsyncpa [#allocation5], 0 }
   0x4   :  { %18 = vsyncpa [#allocation5 + $0x1], 0  ;;  %s3862_s24 = smov 0   ;;  %s3864_s25 = smov 0  }
   0x5   :  { %s3866_s26 = smov 0   ;;  %s3868_s27 = smov 0  }
   0x6 LB: > { %s3883_s28 = sadd.s32 4294967295, %s3810_s27   ;;  %s2891_s29 = sadd.s32 4294967294, %s3810_s27   ;;  %s3810_s27 = sphi %s3868_s27, %s4545_s27   ;;  %s3806_s26 = sphi %s3866_s26, %s4544_s26   ;;  %s3802_s25 = sphi %s3864_s25, %s4543_s25   ;;  %s3798_s24 = sphi %s3862_s24, %s4542_s24  }
   0x7   : > { %p44_p0 = scmp.ne.s32.totalorder %s3802_s25, %s3798_s24  ;;  %p4516_p1 = scmp.eq.s32.totalorder %s3883_s28, 0 }
   0x8   : > { %p200_p3 = scmp.eq.s32.totalorder %s2891_s29, 1  ;;  %p2892_p5 = scmp.ge.s32.totalorder %s3810_s27, 1 }
   0x9   : > { %p3892_p4 = por %p4516_p1, %p44_p0  ;;  %p207_p7 = scmp.lt.s32.totalorder %s3810_s27, 3 }
   0xa   : > { %p3897_p6 = por %p200_p3, %p44_p0  ;;  %s3812_s10 = smov [#allocation6]  }
   0xb   : > { %s4519_s30 = scalar_select %p3892_p4, 1, 0 }
   0xc   : > { %s4520_s8 = scalar_select %p3897_p6, 1, 0 }
   0xd   : > { %p3902_p8 = pnand %p2892_p5, %p207_p7  ;;  %s225_s11 = sshll.u32 %s3812_s10, 4  ;;  %s3906_s11 = int_to_ptr.vmem [resolvable:$true] %s225_s11 }
   0xe   : > { %s3918_s13 = sadd.s32 1, %s3810_s27   ;;  %s31_s14 = sadd.s32 1, %s3806_s26 }
   0xf   : > { %s4521_s9 = scalar_select %p3902_p8, 1, 0 }
  0x10   : > { %p3524_p9 = pneg %p3902_p8  ;;  %s28_s15 = ssub.s32 %s3810_s27, %s3918_s13 }
  0x11   : > { %s3682_s18 = scalar_lea.hbm %s4511_s3, 9216 }
  0x12   : > { %p3913_p11 = pnand %p3524_p9, %p4516_p1  ;;  %p3683_p12 = scmp.ne.s32.totalorder %s4511_s3, %s3682_s18 }
  0x13   : > { %p3689_p5 = scmp.lt.u32.totalorder %s3682_s18, %s4511_s3 }
  0x14   : > { %p3684_p13 = pneg %p3913_p11 }
  0x16   : > { %p3685_p0 = pnand %p3684_p13, %p3683_p12 }
  0x18   : > { %p3686_p3 = pneg %p3685_p0 }
  0x1a   : > { %p3691_p7 = pnand %p3689_p5, %p3686_p3 }
  0x1c   : > { %3694 = shalt.err (!%p3691_p7)
}
  0x1d   : > { %s3695_s23 = scalar_lea.vmem %s3906_s11, 9216  ;;  %p3703_p2 = scmp.lt.s32.totalorder %s3906_s11, %s3906_s11 }
  0x1e   : > { %p3696_p9 = scmp.ne.s32.totalorder %s3906_s11, %s3695_s23  ;;  %p3704_p6 = scmp.lt.s32.totalorder %s3695_s23, %s3695_s23 }
  0x20   : > { %p3698_p10 = pnand %p3696_p9, %p3684_p13  ;;  %p3705_p4 = por %p3704_p6, %p3703_p2 }
  0x22   : > { %p3699_p1 = pneg %p3698_p10 }
  0x24   : > { %p3706_p8 = pnand %p3705_p4, %p3699_p1 }
  0x26   : > { %3709 = shalt.err (!%p3706_p8)
}
  0x27   : > { %s3813_s29 = smov 64   ;;  %s3814_s10 = smov 4  }
  0x28   : > { %3527 = dma.hbm_to_vmem [thread:$0]  (!%p3913_p11), %s4511_s3, 9216, %s3906_s11, [#allocation7], %s3813_s29, %s3813_s29, %s3814_s10  }
  0x29   : > { %p29_p2 = scmp.eq.s32.totalorder %s28_s15, 0  ;;  %p38_p1 = scmp.ne.s32.totalorder %s3806_s26, %s3802_s25 }
  0x2a   : > { %p39_p4 = scmp.eq.s32.totalorder %s3810_s27, 0  ;;  %p3537_p6 = scmp.lt.s32.totalorder %s3810_s27, 2 }
  0x2b   : > { %s3949_s18 = scalar_select %p29_p2, %s3806_s26, %s31_s14  }
  0x2c   : > { %p40_p8 = por %p39_p4, %p38_p1  ;;  %p4523_p10 = scmp.eq.s32.totalorder %s3883_s28, 1 }
  0x2d   : > { %s248_s20 = sand.u32 1, %s3806_s26   ;;  %s3064_s21 = sshll.u32 %s3810_s27, 10 }
  0x2e   : > { %p3953_p12 = por %p4523_p10, %p38_p1  ;;  %s2895_s22 = sshll.u32 %s248_s20, 6 }
  0x2f   : > { %s3962_s16 = scalar_lea.hbm %s4508_s0, %s3064_s21  ;;  %s252_s11 = scalar_lea.vmem [#allocation3], %s2895_s22 }
  0x30   : > { %s259_s14 = sshll.u32 %s252_s11, 4  ;;  %p3964_p11 = pnand %p3537_p6, %p40_p8  ;;  %s3968_s14 = int_to_ptr.vmem [resolvable:$true] %s259_s14 }
  0x31   : > { %s3970_s29 = scalar_lea.sflag [#allocation4], %s248_s20  ;;  %s3710_s10 = scalar_lea.hbm %s3962_s16, 1024 }
  0x32   : > { %p3711_p13 = scmp.ne.s32.totalorder %s3962_s16, %s3710_s10  ;;  %p3712_p0 = pneg %p3964_p11 }
  0x33   : > { %s3715_s22 = scalar_lea.hbm %s4508_s0, 2048  ;;  %p3716_p7 = scmp.lt.u32.totalorder %s3962_s16, %s4508_s0 }
  0x34   : > { %p3713_p3 = pnand %p3712_p0, %p3711_p13  ;;  %p3717_p9 = scmp.lt.u32.totalorder %s3715_s22, %s3710_s10 }
  0x35   : > { %p3719_p1 = scmp.lt.u32.totalorder %s3710_s10, %s3962_s16 }
  0x36   : > { %p3714_p5 = pneg %p3713_p3  ;;  %p3718_p2 = por %p3717_p9, %p3716_p7 }
  0x38   : > { %p3720_p4 = por %p3719_p1, %p3718_p2 }
  0x3a   : > { %p3721_p6 = pnand %p3720_p4, %p3714_p5 }
  0x3c   : > { %3724 = shalt.err (!%p3721_p6)
}
  0x3d   : > { %s3725_s20 = scalar_lea.vmem %s3968_s14, 1024  ;;  %s3815_s11 = smov [#allocation3]  }
  0x3e   : > { %p3726_p8 = scmp.ne.s32.totalorder %s3968_s14, %s3725_s20  ;;  %s3730_s17 = sshll.u32 %s3815_s11, 4  ;;  %s3731_s17 = int_to_ptr.vmem [resolvable:$false] %s3730_s17 }
  0x3f   : > { %s3732_s21 = scalar_lea.vmem %s3731_s17, 2048  ;;  %p3733_p3 = scmp.lt.s32.totalorder %s3968_s14, %s3731_s17 }
  0x40   : > { %p3728_p10 = pnand %p3726_p8, %p3712_p0  ;;  %p3734_p7 = scmp.lt.s32.totalorder %s3732_s21, %s3725_s20 }
  0x42   : > { %p3729_p13 = pneg %p3728_p10  ;;  %p3735_p9 = por %p3734_p7, %p3733_p3 }
  0x44   : > { %p3736_p2 = pnand %p3735_p9, %p3729_p13 }
  0x46   : > { %3739 = shalt.err (!%p3736_p2)
}
  0x47   : > { %s3816_s10 = smov 128   ;;  %s3817_s22 = smov 8  }
  0x48   : > { %3531 = dma.hbm_to_vmem [thread:$0]  (!%p3964_p11), %s3962_s16, 1024, %s3968_s14, %s3970_s29, %s3816_s10, %s3816_s10, %s3817_s22  }
  0x49   : > { %p4526_p0 = scmp.ne.s32.totalorder %s4521_s9, 0 }
  0x4a   : > { %s4001_s12 = sand.u32 (!%p4526_p0), 1, %s3802_s25   ;;  %p4527_p5 = scmp.ne.s32.totalorder (!%p4526_p0), %s4519_s30, 0 }
  0x4b   : > { %271 = sbr.rel (%p4526_p0) target bundleno = 955 (0x3bb), region = 48  ;;  %s2899_s23 = sshll.u32 (!%p4526_p0), %s4001_s12, 6 }
  0x4c   : > { %s274_s20 = scalar_lea.sflag (!%p4526_p0), [#allocation4], %s4001_s12  ;;  %s4007_s11 = scalar_lea.vmem (!%p4526_p0), [#allocation3], %s2899_s23 }
  0x52   : > { %3785 = dma.done.wait (%p4527_p5), %s274_s20, 1024  }
  0x53   : > { %3787 = vsyncadd (%p4527_p5), %s274_s20, 4294966272  ;;  %p4528_p11 = scmp.eq.s32.totalorder %s3883_s28, 0 }
  0x55   : > { %3789 = dma.done.wait (%p4528_p11), [#allocation7], 9216   ;;  %p4529_p1 = pmov %p4528_p11 }
  0x56   : > { %v3580_v0 = vld [vmem:[%s4509_s1] sm:$0xff]   ;;  %v3581_v1 = vld [vmem:[%s4509_s1 + $0x8] sm:$0xff]   ;;  %v313_v2 = vld [vmem:[%s4007_s11] sm:$0xff]  ;;  %vm348_vm0 = vcmask 261120   ;;  %vm444_vm1 = vcmask 1040384   ;;  %v3818_v52 = vmov 0  }
  0x57   : > { %3791 = vsyncadd (%p4529_p1), [#allocation7], 4294958080  ;;  %3200 = vmatprep.subr.bf16.mxu0 %v3580_v0  ;;  %v314_v3 = vld [vmem:[%s4007_s11 + $0x8] sm:$0xff]  ;;  %v315_v5 = vld [vmem:[%s4007_s11 + $0x10] sm:$0xff]  ;;  %vm445_vm2 = vsmask.f32 256 }
  0x58   : > { %3201 = vmatpush3.bf16.msra.mxu0 %v3580_v0  ;;  %v321_v4 = vpack.c.bf16 %v314_v3, %v313_v2  ;;  %v316_v6 = vld [vmem:[%s4007_s11 + $0x18] sm:$0xff]  ;;  %v317_v7 = vld [vmem:[%s4007_s11 + $0x20] sm:$0xff]  ;;  %v318_v8 = vld [vmem:[%s4007_s11 + $0x28] sm:$0xff]  ;;  %vm471_vm3 = vsmask.f32 7938  ;;  %vm597_vm6 = vcmask 1043456  }
  0x59   : > { %3202 = vmatprep.subr.bf16.mxu0 %v3581_v1  ;;  %v322_v9 = vpack.c.bf16 %v316_v6, %v315_v5  ;;  %v323_v10 = vpack.c.bf16 %v318_v8, %v317_v7  ;;  %v319_v11 = vld [vmem:[%s4007_s11 + $0x30] sm:$0xff]  ;;  %v320_v12 = vld [vmem:[%s4007_s11 + $0x38] sm:$0xff]  ;;  %v3582_v14 = vld [vmem:[#allocation6 + $0x40] sm:$0xff]   ;;  %438 = vst [vmem:[#allocation2] sm:$0xf] %v3818_v52  ;;  %vm1100_vm11 = vcmask 1042432  }
  0x5a   : > { %3204 = vmatprep.mubr.msk.bf16.mxu0 %vm348_vm0, %v321_v4  ;;  %v324_v13 = vpack.c.bf16 %v320_v12, %v319_v11  ;;  %v3583_v15 = vld [vmem:[#allocation6 + $0x100] sm:$0xff]   ;;  %vm4035_vm4 = vmand %vm444_vm1, %vm445_vm2  ;;  %v453_v17 = vld [vmem:[#allocation2 + $0x18] sm:$0x1]  ;;  %439 = vst [vmem:[#allocation2 + $0x4] sm:$0x1] %v3818_v52  ;;  %vm1101_vm12 = vcmask 1046532  }
  0x5b   : > { %v479_v18 = vld [vmem:[#allocation2 + $0x1c] sm:$0x1]  ;;  %v454_v19 = vsel %vm4035_vm4, 0, %v453_v17  ;;  %vm4042_vm5 = vmand %vm444_vm1, %vm471_vm3  ;;  %v447_v21 = vld [vmem:[#allocation2 + $0x8] sm:$0x1]  ;;  %3308 = vmatprep.subr.bf16.mxu1 %v3583_v15  ;;  %s4435_s30 = scalar_lea.vmem [#allocation8], %s2899_s23 }
  0x5c   : > { %3203 = vmatpush3.bf16.msra.mxu0 %v3581_v1  ;;  %v473_v22 = vld [vmem:[#allocation2 + $0xc] sm:$0x1]  ;;  %455 = vst [vmem:[#allocation2 + $0x18] sm:$0x1] %v454_v19  ;;  %v480_v23 = vsel %vm4042_vm5, 0, %v479_v18  ;;  %v448_v24 = vsel %vm4035_vm4, 0, %v447_v21  ;;  %3309 = vmatpush3.bf16.msra.mxu1 %v3583_v15  ;;  %vm4105_vm7 = vmand %vm597_vm6, %vm471_vm3 }
  0x5d   : > { %3212 = vmatprep.subr.bf16.mxu0 %v3582_v14  ;;  %v474_v25 = vsel %vm4042_vm5, 0, %v473_v22  ;;  %v456_v26 = vld [vmem:[#allocation2 + $0x20] sm:$0x1]  ;;  %v3584_v27 = vld [vmem:[#allocation6 + $0x48] sm:$0xff]   ;;  %481 = vst [vmem:[#allocation2 + $0x1c] sm:$0x1] %v480_v23  ;;  %vm4268_vm13 = vmor %vm1100_vm11, %vm1101_vm12 }
  0x5e   : > { %449 = vst [vmem:[#allocation2 + $0x8] sm:$0x1] %v448_v24  ;;  %475 = vst [vmem:[#allocation2 + $0xc] sm:$0x1] %v474_v25  ;;  %v457_v28 = vsel %vm4035_vm4, 0, %v456_v26  ;;  %v3585_v31 = vld [vmem:[#allocation6 + $0x108] sm:$0xff]  }
  0x5f   : > { %3205 = vmatmul.mubr.msk.bf16.vlgmr.msra.gmra.mrb[0].mxu0 %vm348_vm0, %v322_v9  ;;  %v482_v29 = vld [vmem:[#allocation2 + $0x24] sm:$0x1]  ;;  %v450_v30 = vld [vmem:[#allocation2 + $0x10] sm:$0x1]  ;;  %458 = vst [vmem:[#allocation2 + $0x20] sm:$0x1] %v457_v28  ;;  %3310 = vmatprep.subr.bf16.mxu1 %v3585_v31 }
  0x60   : > { %3208 = vmatprep.mubr.msk.bf16.mxu0 %vm348_vm0, %v323_v10  ;;  %3213 = vmatpush3.bf16.msra.mxu0 %v3582_v14  ;;  %v483_v32 = vsel %vm4042_vm5, 0, %v482_v29  ;;  %v451_v33 = vsel %vm4035_vm4, 0, %v450_v30  ;;  %v476_v34 = vld [vmem:[#allocation2 + $0x14] sm:$0x1]  ;;  %v459_v36 = vld [vmem:[#allocation2 + $0x28] sm:$0x1] }
  0x61   : > { %3214 = vmatprep.subr.bf16.mxu0 %v3584_v27  ;;  %484 = vst [vmem:[#allocation2 + $0x24] sm:$0x1] %v483_v32  ;;  %452 = vst [vmem:[#allocation2 + $0x10] sm:$0x1] %v451_v33  ;;  %v477_v35 = vsel %vm4042_vm5, 0, %v476_v34  ;;  %3311 = vmatpush3.bf16.msra.mxu1 %v3585_v31  ;;  %v460_v38 = vsel %vm4035_vm4, 0, %v459_v36 }
  0x62   : > { %478 = vst [vmem:[#allocation2 + $0x14] sm:$0x1] %v477_v35  ;;  %v465_v37 = vld [vmem:[#allocation2 + $0x38] sm:$0x1]  ;;  %v3586_v39 = vld [vmem:[#allocation6 + $0x50] sm:$0xff]   ;;  %v3588_v45 = vld [vmem:[#allocation6 + $0x58] sm:$0xff]  }
  0x63   : > { %v466_v40 = vsel %vm4035_vm4, 0, %v465_v37  ;;  %461 = vst [vmem:[#allocation2 + $0x28] sm:$0x1] %v460_v38  ;;  %v3587_v41 = vld [vmem:[#allocation6 + $0x110] sm:$0xff]   ;;  %v485_v42 = vld [vmem:[#allocation2 + $0x2c] sm:$0x1] }
  0x64   : > { %3215 = vmatpush3.bf16.msra.mxu0 %v3584_v27  ;;  %467 = vst [vmem:[#allocation2 + $0x38] sm:$0x1] %v466_v40  ;;  %v491_v43 = vld [vmem:[#allocation2 + $0x3c] sm:$0x1]  ;;  %v486_v44 = vsel %vm4042_vm5, 0, %v485_v42  ;;  %3312 = vmatprep.subr.bf16.mxu1 %v3587_v41  ;;  %v3589_v49 = vld [vmem:[#allocation6 + $0x118] sm:$0xff]  }
  0x65   : > { %3216 = vmatprep.subr.bf16.mxu0 %v3586_v39  ;;  %v492_v46 = vsel %vm4042_vm5, 0, %v491_v43  ;;  %487 = vst [vmem:[#allocation2 + $0x2c] sm:$0x1] %v486_v44  ;;  %v468_v47 = vld [vmem:[#allocation2 + $0x40] sm:$0x1]  ;;  %3313 = vmatpush3.bf16.msra.mxu1 %v3587_v41  ;;  %v3590_v53 = vld [vmem:[#allocation6 + $0x60] sm:$0xff]  }
  0x66   : > { %v462_v48 = vld [vmem:[#allocation2 + $0x30] sm:$0x1]  ;;  %493 = vst [vmem:[#allocation2 + $0x3c] sm:$0x1] %v492_v46  ;;  %v469_v50 = vsel %vm4035_vm4, 0, %v468_v47  ;;  %3314 = vmatprep.subr.bf16.mxu1 %v3589_v49  ;;  %v3592_v59 = vld [vmem:[#allocation6 + $0x68] sm:$0xff]  }
  0x67   : > { %3209 = vmatmul.mubr.msk.bf16.gmra.mrb[4].mxu0 %vm348_vm0, %v324_v13  ;;  %v463_v51 = vsel %vm4035_vm4, 0, %v462_v48  ;;  %470 = vst [vmem:[#allocation2 + $0x40] sm:$0x1] %v469_v50  ;;  %441 = vst [vmem:[#allocation2 + $0x48] sm:$0xf] %v3818_v52  ;;  %v3591_v58 = vld [vmem:[#allocation6 + $0x120] sm:$0xff]  }
  0x68   : > { %3217 = vmatpush3.bf16.msra.mxu0 %v3586_v39  ;;  %464 = vst [vmem:[#allocation2 + $0x30] sm:$0x1] %v463_v51  ;;  %442 = vst [vmem:[#allocation2 + $0x4c] sm:$0x1] %v3818_v52  ;;  %v494_v54 = vld [vmem:[#allocation2 + $0x44] sm:$0x1] }
  0x69   : > { %3218 = vmatprep.subr.bf16.mxu0 %v3588_v45  ;;  %v488_v55 = vld [vmem:[#allocation2 + $0x34] sm:$0x1]  ;;  %3315 = vmatpush3.bf16.msra.mxu1 %v3589_v49  ;;  %v495_v56 = vsel %vm4042_vm5, 0, %v494_v54  ;;  %v3593_v60 = vld [vmem:[#allocation6 + $0x128] sm:$0xff]   ;;  %v3594_v61 = vld [vmem:[#allocation6 + $0x70] sm:$0xff]   ;;  %s3073_s23 = sshll.u32 %s3883_s28, 10 }
  0x6a   : > { %v489_v57 = vsel %vm4042_vm5, 0, %v488_v55  ;;  %496 = vst [vmem:[#allocation2 + $0x44] sm:$0x1] %v495_v56  ;;  %3316 = vmatprep.subr.bf16.mxu1 %v3591_v58  ;;  %v3595_v62 = vld [vmem:[#allocation6 + $0x130] sm:$0xff]   ;;  %v3596_v63 = vld [vmem:[#allocation6 + $0x78] sm:$0xff]   ;;  %v4076_v1 = vld [vmem:[#allocation6] sm:$0xff]   ;;  %s4456_s10 = scalar_lea.hbm %s4515_s7, %s3073_s23 }
  0x6b   : > { %490 = vst [vmem:[#allocation2 + $0x34] sm:$0x1] %v489_v57  ;;  %v3597_v0 = vld [vmem:[#allocation6 + $0x138] sm:$0xff]   ;;  %v4079_v2 = vld [vmem:[#allocation6 + $0x140] sm:$0xff]   ;;  %v4085_v3 = vld [vmem:[%s4510_s2] ss:$0 sm:$0xff] }
  0x6c   : > { %3219 = vmatpush3.bf16.msra.mxu0 %v3588_v45  ;;  %v4087_v5 = vld [vmem:[#allocation2] sm:$0xf]  ;;  %v4095_v20 = vld [vmem:[#allocation2 + $0x4] sm:$0x1]  ;;  %v611_v29 = vld [vmem:[#allocation2 + $0x18] sm:$0xf] }
  0x6d   : > { %3220 = vmatprep.subr.bf16.mxu0 %v3590_v53  ;;  %3317 = vmatpush3.bf16.msra.mxu1 %v3591_v58  ;;  %v683_v13 = vshrl.u32 %v4087_v5, 16  ;;  %v686_v14 = vshll.u32 %v4087_v5, 16  ;;  %v692_v23 = vshll.u32 %v4095_v20, 16  ;;  %v614_v30 = vld [vmem:[#allocation2 + $0x1c] sm:$0x1]  ;;  %s2808_s29 = sshll.u32 %s4435_s30, 4  ;;  %s4458_s29 = int_to_ptr.vmem [resolvable:$true] %s2808_s29 }
  0x6e   : > { %3318 = vmatprep.subr.bf16.mxu1 %v3593_v60  ;;  %v599_v36 = vld [vmem:[#allocation2 + $0x8] sm:$0xf]  ;;  %v602_v43 = vld [vmem:[#allocation2 + $0xc] sm:$0x1]  ;;  %v617_v51 = vld [vmem:[#allocation2 + $0x20] sm:$0xf] }
  0x6f   : > { %v4098_v26 = vrot.slane %v683_v13, 4  ;;  %v4100_v27 = vrot.slane %v686_v14, 5  ;;  %v620_v56 = vld [vmem:[#allocation2 + $0x24] sm:$0x1]  ;;  %vm679_vm8 = vsmask.f32 3328 }
  0x70   : > { %3221 = vmatpush3.bf16.msra.mxu0 %v3590_v53  ;;  %vm680_vm9 = vsmask.f32 7440  ;;  %s2795_s28 = scalar_lea.sflag [#allocation5], %s4001_s12  ;;  %s3819_s22 = smov [#allocation8]  }
  0x71   : > { %3222 = vmatprep.subr.bf16.mxu0 %v3592_v59  ;;  %3319 = vmatpush3.bf16.msra.mxu1 %v3593_v60  ;;  %vm4157_vm10 = vmor %vm679_vm8, %vm680_vm9  ;;  %s3744_s20 = sshll.u32 %s3819_s22, 4  ;;  %s3745_s20 = int_to_ptr.vmem [resolvable:$false] %s3744_s20 }
  0x72   : > { %3320 = vmatprep.subr.bf16.mxu1 %v3595_v62  ;;  %s3746_s9 = scalar_lea.vmem %s3745_s20, 2048  ;;  %p3747_p10 = scmp.lt.s32.totalorder %s4458_s29, %s3745_s20 }
  0x74   : > { %3223 = vmatpush3.bf16.msra.mxu0 %v3592_v59 }
  0x75   : > { %3224 = vmatprep.subr.bf16.mxu0 %v3594_v61  ;;  %3321 = vmatpush3.bf16.msra.mxu1 %v3595_v62 }
  0x76   : > { %3322 = vmatprep.subr.bf16.mxu1 %v3597_v0 }
  0x78   : > { %3225 = vmatpush3.bf16.msra.mxu0 %v3594_v61 }
  0x79   : > { %3226 = vmatprep.subr.bf16.mxu0 %v3596_v63  ;;  %3323 = vmatpush3.bf16.msra.mxu1 %v3597_v0  ;;  %v608_v0 = vld [vmem:[#allocation2 + $0x14] sm:$0x1] }
  0x7a   : > { %3332 = vmatprep.subr.bf16.mxu1 %v4079_v2 }
  0x7c   : > { %3227 = vmatpush3.bf16.msra.mxu0 %v3596_v63  ;;  %v605_v63 = vld [vmem:[#allocation2 + $0x10] sm:$0xf] }
  0x7d   : > { %3236 = vmatprep.subr.bf16.mxu0 %v4076_v1 }
 0x132   : > { %v3206_v4 = vpop.f32.mrb[0].mxu0 }
 0x133   : > { %v404_v6 = vadd.f32 %v3206_v4, %v4085_v3  ;;  %v395_v7 = vpop.f32.mrb[1].mxu0 }
 0x134   : > { %v396_v8 = vadd.f32 %v4085_v3, %v395_v7  ;;  %v3207_v9 = vpop.f32.mrb[2].mxu0 }
 0x135   : > { %v428_v10 = vmax.f32 %v404_v6, 0.0  ;;  %v407_v11 = vadd.f32 %v3207_v9, %v4085_v3  ;;  %v398_v12 = vpop.f32.mrb[3].mxu0 }
 0x136   : > { %v426_v15 = vmax.f32 %v396_v8, 0.0  ;;  %v399_v17 = vadd.f32 %v4085_v3, %v398_v12 }
 0x137   : > { %v3067_v18 = vpack.c.bf16 %v428_v10, %v428_v10  ;;  %v429_v19 = vmax.f32 %v407_v11, 0.0 }
 0x138   : > { %v3065_v21 = vpack.c.bf16 %v426_v15, %v426_v15  ;;  %v427_v22 = vmax.f32 %v399_v17, 0.0 }
 0x139   : > { %v534_v24 = vshrl.u32 %v3067_v18, 16  ;;  %v3068_v25 = vpack.c.bf16 %v429_v19, %v429_v19  ;;  %v537_v28 = vshll.u32 %v3067_v18, 16 }
 0x13a   : > { %v518_v31 = vshrl.u32 %v3065_v21, 16  ;;  %v521_v32 = vshll.u32 %v3065_v21, 16  ;;  %v3066_v33 = vpack.c.bf16 %v427_v22, %v427_v22  ;;  %v3210_v34 = vpop.f32.mrb[4].mxu0 }
 0x13b   : > { %v536_v35 = vrot.slane %v534_v24, 7  ;;  %v542_v37 = vshrl.u32 %v3068_v25, 16  ;;  %v545_v38 = vshll.u32 %v3068_v25, 16  ;;  %v420_v39 = vadd.f32 %v3210_v34, %v4085_v3  ;;  %v411_v40 = vpop.f32.mrb[5].mxu0  ;;  %v635_v24 = vld [vmem:[#allocation2 + $0x38] sm:$0xf] }
 0x13c   : > { %v520_v42 = vrot.slane %v518_v31, 7  ;;  %v526_v44 = vshrl.u32 %v3066_v33, 16  ;;  %v529_v45 = vshll.u32 %v3066_v33, 16  ;;  %v412_v46 = vadd.f32 %v4085_v3, %v411_v40  ;;  %v3211_v47 = vpop.f32.mrb[6].mxu0  ;;  %v623_v25 = vld [vmem:[#allocation2 + $0x28] sm:$0xf] }
 0x13d   : > { %v539_v48 = vor.u32 %v537_v28, %v536_v35  ;;  %v540_v49 = vrot.slane %v536_v35, 4  ;;  %v544_v50 = vrot.slane %v542_v37, 7  ;;  %v432_v52 = vmax.f32 %v420_v39, 0.0  ;;  %v414_v53 = vpop.f32.mrb[7].mxu0  ;;  %v626_v33 = vld [vmem:[#allocation2 + $0x2c] sm:$0x1] }
 0x13e   : > { %v523_v54 = vor.u32 %v521_v32, %v520_v42  ;;  %v524_v55 = vrot.slane %v520_v42, 4  ;;  %v528_v57 = vrot.slane %v526_v44, 7  ;;  %v430_v58 = vmax.f32 %v412_v46, 0.0  ;;  %v638_v32 = vld [vmem:[#allocation2 + $0x3c] sm:$0x1] }
 0x13f   : > { %v612_v59 = vsel %vm4105_vm7, %v539_v48, %v611_v29  ;;  %v615_v60 = vsel %vm4035_vm4, %v540_v49, %v614_v30  ;;  %v547_v61 = vor.u32 %v545_v38, %v544_v50  ;;  %v548_v62 = vrot.slane %v544_v50, 4  ;;  %v641_v49 = vld [vmem:[#allocation2 + $0x40] sm:$0xf]  ;;  %v644_v50 = vld [vmem:[#allocation2 + $0x44] sm:$0x1] }
 0x140   : > { %613 = vst [vmem:[#allocation2 + $0x18] sm:$0xf] %v612_v59  ;;  %616 = vst [vmem:[#allocation2 + $0x1c] sm:$0x1] %v615_v60  ;;  %v600_v4 = vsel %vm4105_vm7, %v523_v54, %v599_v36  ;;  %v603_v6 = vsel %vm4035_vm4, %v524_v55, %v602_v43  ;;  %v531_v7 = vor.u32 %v529_v45, %v528_v57  ;;  %v532_v8 = vrot.slane %v528_v57, 4 }
 0x141   : > { %601 = vst [vmem:[#allocation2 + $0x8] sm:$0xf] %v600_v4  ;;  %604 = vst [vmem:[#allocation2 + $0xc] sm:$0x1] %v603_v6  ;;  %v618_v9 = vsel %vm4105_vm7, %v547_v61, %v617_v51  ;;  %v621_v10 = vsel %vm4035_vm4, %v548_v62, %v620_v56  ;;  %v3071_v11 = vpack.c.bf16 %v432_v52, %v432_v52  ;;  %v4132_v36 = vrot.slane %v692_v23, 5 }
 0x142   : > { %v3069_v12 = vpack.c.bf16 %v430_v58, %v430_v58  ;;  %619 = vst [vmem:[#allocation2 + $0x20] sm:$0xf] %v618_v9  ;;  %622 = vst [vmem:[#allocation2 + $0x24] sm:$0x1] %v621_v10  ;;  %v606_v13 = vsel %vm4105_vm7, %v531_v7, %v605_v63  ;;  %v609_v14 = vsel %vm4035_vm4, %v532_v8, %v608_v0  ;;  %v629_v51 = vld [vmem:[#allocation2 + $0x30] sm:$0xf] }
 0x143   : > { %v423_v15 = vadd.f32 %v3211_v47, %v4085_v3  ;;  %v415_v17 = vadd.f32 %v4085_v3, %v414_v53  ;;  %607 = vst [vmem:[#allocation2 + $0x10] sm:$0xf] %v606_v13  ;;  %610 = vst [vmem:[#allocation2 + $0x14] sm:$0x1] %v609_v14  ;;  %v566_v18 = vshrl.u32 %v3071_v11, 16  ;;  %v569_v19 = vshll.u32 %v3071_v11, 16 }
 0x144   : > { %v550_v21 = vshrl.u32 %v3069_v12, 16  ;;  %v553_v22 = vshll.u32 %v3069_v12, 16  ;;  %v689_v3 = vor.u32 %v4100_v27, %v4098_v26  ;;  %v632_v58 = vld [vmem:[#allocation2 + $0x34] sm:$0x1]  ;;  %v3663_v7 = vld [vmem:[#allocation6 + $0x228] sm:$0xff]  }
 0x145   : > { %v433_v28 = vmax.f32 %v423_v15, 0.0  ;;  %v431_v29 = vmax.f32 %v415_v17, 0.0  ;;  %v568_v30 = vrot.slane %v566_v18, 7 }
 0x146   : > { %v552_v31 = vrot.slane %v550_v21, 7  ;;  %v690_v59 = vrot.slane %v689_v3, 4 }
 0x147   : > { %v3072_v34 = vpack.c.bf16 %v433_v28, %v433_v28  ;;  %v3070_v35 = vpack.c.bf16 %v431_v29, %v431_v29  ;;  %v571_v37 = vor.u32 %v569_v19, %v568_v30  ;;  %v572_v38 = vrot.slane %v568_v30, 4  ;;  %v4134_v42 = vld [vmem:[#allocation2 + $0x18] sm:$0xf]  ;;  %v4172_v19 = vld [vmem:[#allocation2 + $0x1c] sm:$0x1] }
 0x148   : > { %v555_v39 = vor.u32 %v553_v22, %v552_v31  ;;  %v556_v40 = vrot.slane %v552_v31, 4  ;;  %v4136_v47 = vld [vmem:[#allocation2 + $0x8] sm:$0xf]  ;;  %v4146_v52 = vld [vmem:[#allocation2 + $0xc] sm:$0x1]  ;;  %v725_v62 = vshrl.u32 %v4134_v42, 16  ;;  %v695_v21 = vsel %vm4157_vm10, %v690_v59, %v4132_v36 }
 0x149   : > { %v574_v43 = vshrl.u32 %v3072_v34, 16  ;;  %v577_v44 = vshll.u32 %v3072_v34, 16  ;;  %v558_v45 = vshrl.u32 %v3070_v35, 16  ;;  %v561_v46 = vshll.u32 %v3070_v35, 16  ;;  %v1457_v13 = vld [vmem:[#allocation2 + $0x8] sm:$0xf] }
 0x14a   : > { %v636_v48 = vsel %vm4105_vm7, %v571_v37, %v635_v24  ;;  %v639_v26 = vsel %vm4035_vm4, %v572_v38, %v638_v32  ;;  %v624_v23 = vsel %vm4105_vm7, %v555_v39, %v623_v25  ;;  %v627_v27 = vsel %vm4035_vm4, %v556_v40, %v626_v33  ;;  %v4150_v57 = vld [vmem:[#allocation2 + $0x10] sm:$0xf]  ;;  %v4161_v8 = vld [vmem:[#allocation2 + $0x14] sm:$0x1]  ;;  %v4178_v28 = vld [vmem:[#allocation2 + $0xc] sm:$0x1] }
 0x14b   : > { %637 = vst [vmem:[#allocation2 + $0x38] sm:$0xf] %v636_v48  ;;  %640 = vst [vmem:[#allocation2 + $0x3c] sm:$0x1] %v639_v26  ;;  %v576_v53 = vrot.slane %v574_v43, 7  ;;  %v560_v54 = vrot.slane %v558_v45, 7 }
 0x14c   : > { %625 = vst [vmem:[#allocation2 + $0x28] sm:$0xf] %v624_v23  ;;  %628 = vst [vmem:[#allocation2 + $0x2c] sm:$0x1] %v627_v27  ;;  %v697_v55 = vshrl.u32 %v4136_v47, 16  ;;  %v700_v56 = vshll.u32 %v4136_v47, 16 }
 0x14d   : > { %v711_v60 = vshrl.u32 %v4150_v57, 16  ;;  %v714_v61 = vshll.u32 %v4150_v57, 16  ;;  %v579_v63 = vor.u32 %v577_v44, %v576_v53  ;;  %v580_v0 = vrot.slane %v576_v53, 4  ;;  %v1459_v29 = vld [vmem:[#allocation2 + $0x10] sm:$0xf] }
 0x14e   : > { %v563_v4 = vor.u32 %v561_v46, %v560_v54  ;;  %v564_v6 = vrot.slane %v560_v54, 4  ;;  %v699_v9 = vrot.slane %v697_v55, 4  ;;  %v702_v10 = vrot.slane %v700_v56, 5  ;;  %v4182_v36 = vld [vmem:[#allocation2 + $0x14] sm:$0x1] }
 0x14f   : > { %v706_v11 = vshll.u32 %v4146_v52, 16  ;;  %v713_v12 = vrot.slane %v711_v60, 4  ;;  %v642_v14 = vsel %vm4105_vm7, %v579_v63, %v641_v49  ;;  %v645_v15 = vsel %vm4035_vm4, %v580_v0, %v644_v50  ;;  %v1461_v27 = vld [vmem:[#allocation2 + $0x18] sm:$0xf]  ;;  %v4187_v49 = vld [vmem:[#allocation2 + $0x1c] sm:$0x1] }
 0x150   : > { %v630_v17 = vsel %vm4105_vm7, %v563_v4, %v629_v51  ;;  %v633_v18 = vsel %vm4035_vm4, %v564_v6, %v632_v58  ;;  %643 = vst [vmem:[#allocation2 + $0x40] sm:$0xf] %v642_v14  ;;  %646 = vst [vmem:[#allocation2 + $0x44] sm:$0x1] %v645_v15  ;;  %v703_v22 = vor.u32 %v702_v10, %v699_v9  ;;  %v716_v24 = vrot.slane %v714_v61, 5  ;;  %v3600_v15 = vld [vmem:[#allocation6 + $0x8] sm:$0xff]  }
 0x151   : > { %631 = vst [vmem:[#allocation2 + $0x30] sm:$0xf] %v630_v17  ;;  %634 = vst [vmem:[#allocation2 + $0x34] sm:$0x1] %v633_v18  ;;  %v720_v25 = vshll.u32 %v4161_v8, 16  ;;  %v727_v41 = vrot.slane %v725_v62, 4 }
 0x152   : > { %v728_v16 = vshll.u32 %v4134_v42, 16  ;;  %v1474_v30 = vshrl.u32 %v1457_v13, 16  ;;  %v1477_v31 = vshll.u32 %v1457_v13, 16  ;;  %v704_v32 = vrot.slane %v703_v22, 4  ;;  %v1463_v53 = vld [vmem:[#allocation2 + $0x20] sm:$0xf] }
 0x153   : > { %v708_v33 = vrot.slane %v706_v11, 5  ;;  %v717_v34 = vor.u32 %v716_v24, %v713_v12  ;;  %v734_v35 = vshll.u32 %v4172_v19, 16  ;;  %v722_v3 = vrot.slane %v720_v25, 5  ;;  %v4192_v60 = vld [vmem:[#allocation2 + $0x24] sm:$0x1] }
 0x154   : > { %v730_v37 = vrot.slane %v728_v16, 5  ;;  %v1476_v38 = vrot.slane %v1474_v30, 4  ;;  %v1479_v39 = vrot.slane %v1477_v31, 5  ;;  %v1483_v44 = vshll.u32 %v4178_v28, 16  ;;  %v4197_v10 = vld [vmem:[#allocation2 + $0x20] sm:$0xf] }
 0x155   : > { %v709_v40 = vsel %vm4157_vm10, %v704_v32, %v708_v33  ;;  %v718_v43 = vrot.slane %v717_v34, 4  ;;  %v1488_v45 = vshrl.u32 %v1459_v29, 16  ;;  %v1491_v23 = vshll.u32 %v1459_v29, 16  ;;  %v4200_v24 = vld [vmem:[#allocation2 + $0x24] sm:$0x1] }
 0x156   : > { %v2917_v46 = vcombine.low %v695_v21, %v709_v40  ;;  %v731_v48 = vor.u32 %v730_v37, %v727_v41  ;;  %v1480_v26 = vor.u32 %v1479_v39, %v1476_v38  ;;  %v1497_v51 = vshll.u32 %v4182_v36, 16  ;;  %v4204_v29 = vld [vmem:[#allocation2 + $0x28] sm:$0xf]  ;;  %v4213_v38 = vld [vmem:[#allocation2 + $0x2c] sm:$0x1] }
 0x157   : > { %v1490_v50 = vrot.slane %v1488_v45, 4  ;;  %v723_v54 = vsel %vm4157_vm10, %v718_v43, %v722_v3  ;;  %v736_v56 = vrot.slane %v734_v35, 5  ;;  %v1493_v58 = vrot.slane %v1491_v23, 5  ;;  %v3602_v43 = vld [vmem:[#allocation6 + $0x10] sm:$0xff]  }
 0x158   : > { %3228 = vmatprep.mubr.bf16.mxu0 %v2917_v46  ;;  %v732_v55 = vrot.slane %v731_v48, 4  ;;  %v1481_v59 = vrot.slane %v1480_v26, 4  ;;  %v1502_v61 = vshrl.u32 %v1461_v27, 16  ;;  %v1505_v62 = vshll.u32 %v1461_v27, 16  ;;  %v4211_v35 = vld [vmem:[#allocation2 + $0x30] sm:$0xf] }
 0x159   : > { %v1511_v63 = vshll.u32 %v4187_v49, 16  ;;  %v1485_v4 = vrot.slane %v1483_v44, 5  ;;  %v1494_v6 = vor.u32 %v1493_v58, %v1490_v50  ;;  %v1516_v9 = vshrl.u32 %v1463_v53, 16  ;;  %v4218_v48 = vld [vmem:[#allocation2 + $0x34] sm:$0x1]  ;;  %v3605_v58 = vld [vmem:[#allocation6 + $0x18] sm:$0xff]  }
 0x15a   : > { %v737_v0 = vsel %vm4157_vm10, %v732_v55, %v736_v56  ;;  %v1499_v12 = vrot.slane %v1497_v51, 5  ;;  %v1504_v13 = vrot.slane %v1502_v61, 4  ;;  %v1507_v14 = vrot.slane %v1505_v62, 5  ;;  %v4223_v50 = vld [vmem:[#allocation2 + $0x38] sm:$0xf] }
 0x15b   : > { %v2918_v11 = vcombine.low %v723_v54, %v737_v0  ;;  %v1495_v17 = vrot.slane %v1494_v6, 4  ;;  %v1518_v18 = vrot.slane %v1516_v9, 4  ;;  %v1519_v21 = vshll.u32 %v1463_v53, 16  ;;  %v4226_v61 = vld [vmem:[#allocation2 + $0x3c] sm:$0x1] }
 0x15c   : > { %v1525_v22 = vshll.u32 %v4192_v60, 16  ;;  %v1486_v25 = vsel %vm4157_vm10, %v1481_v59, %v1485_v4  ;;  %v1508_v41 = vor.u32 %v1507_v14, %v1504_v13  ;;  %v1513_v16 = vrot.slane %v1511_v63, 5  ;;  %v4233_v13 = vld [vmem:[#allocation2 + $0x2c] sm:$0x1] }
 0x15d   : > { %3229 = vmatmul.mubr.bf16.vlgmr.msra.gmra.mrb[8].mxu0 %v2918_v11  ;;  %v739_v30 = vshrl.u32 %v4197_v10, 16  ;;  %v1500_v31 = vsel %vm4157_vm10, %v1495_v17, %v1499_v12  ;;  %v1521_v32 = vrot.slane %v1519_v21, 5  ;;  %v742_v34 = vshll.u32 %v4197_v10, 16  ;;  %v1465_v12 = vld [vmem:[#allocation2 + $0x28] sm:$0xf] }
 0x15e   : > { %3237 = vmatpush3.bf16.msra.mxu0 %v4076_v1  ;;  %v1527_v33 = vrot.slane %v1525_v22, 5  ;;  %v2973_v3 = vcombine.low %v1486_v25, %v1500_v31  ;;  %v1509_v37 = vrot.slane %v1508_v41, 4  ;;  %v748_v40 = vshll.u32 %v4200_v24, 16  ;;  %v1467_v22 = vld [vmem:[#allocation2 + $0x30] sm:$0xf] }
 0x15f   : > { %3238 = vmatprep.subr.bf16.mxu0 %v3600_v15  ;;  %v741_v39 = vrot.slane %v739_v30, 4  ;;  %v1522_v44 = vor.u32 %v1521_v32, %v1518_v18  ;;  %v744_v1 = vrot.slane %v742_v34, 5  ;;  %v753_v45 = vshrl.u32 %v4204_v29, 16  ;;  %v4239_v31 = vld [vmem:[#allocation2 + $0x34] sm:$0x1] }
 0x160   : > { %v756_v46 = vshll.u32 %v4204_v29, 16  ;;  %3324 = vmatprep.mubr.bf16.mxu1 %v2973_v3  ;;  %v1514_v26 = vsel %vm4157_vm10, %v1509_v37, %v1513_v16  ;;  %v750_v23 = vrot.slane %v748_v40, 5  ;;  %v762_v27 = vshll.u32 %v4213_v38, 16  ;;  %v3607_v37 = vld [vmem:[#allocation6 + $0x20] sm:$0xff]  }
 0x161   : > { %v767_v51 = vshrl.u32 %v4211_v35, 16  ;;  %v1523_v53 = vrot.slane %v1522_v44, 4  ;;  %v745_v54 = vor.u32 %v744_v1, %v741_v39  ;;  %v755_v55 = vrot.slane %v753_v45, 4  ;;  %v3603_v45 = vld [vmem:[#allocation6 + $0x150] sm:$0xff]  }
 0x162   : > { %3239 = vmatpush3.bf16.msra.mxu0 %v3600_v15  ;;  %v758_v56 = vrot.slane %v756_v46, 5  ;;  %v764_v59 = vrot.slane %v762_v27, 5  ;;  %v770_v63 = vshll.u32 %v4211_v35, 16  ;;  %v776_v0 = vshll.u32 %v4218_v48, 16  ;;  %v3601_v15 = vld [vmem:[#allocation6 + $0x148] sm:$0xff]  }
 0x163   : > { %3240 = vmatprep.subr.bf16.mxu0 %v3602_v43  ;;  %v769_v62 = vrot.slane %v767_v51, 4  ;;  %v1528_v4 = vsel %vm4157_vm10, %v1523_v53, %v1527_v33  ;;  %v746_v6 = vrot.slane %v745_v54, 4  ;;  %v781_v11 = vshrl.u32 %v4223_v50, 16  ;;  %v1469_v27 = vld [vmem:[#allocation2 + $0x38] sm:$0xf] }
 0x164   : > { %v759_v9 = vor.u32 %v758_v56, %v755_v55  ;;  %v2974_v14 = vcombine.low %v1514_v26, %v1528_v4  ;;  %v772_v17 = vrot.slane %v770_v63, 5  ;;  %v778_v18 = vrot.slane %v776_v0, 5  ;;  %v4245_v51 = vld [vmem:[#allocation2 + $0x3c] sm:$0x1]  ;;  %v4250_v0 = vld [vmem:[#allocation2 + $0x44] sm:$0x1] }
 0x165   : > { %v784_v21 = vshll.u32 %v4223_v50, 16  ;;  %v751_v25 = vsel %vm4157_vm10, %v746_v6, %v750_v23  ;;  %v783_v16 = vrot.slane %v781_v11, 4  ;;  %v790_v30 = vshll.u32 %v4226_v61, 16  ;;  %v3609_v4 = vld [vmem:[#allocation6 + $0x28] sm:$0xff]  }
 0x166   : > { %v760_v41 = vrot.slane %v759_v9, 4  ;;  %3241 = vmatpush3.bf16.msra.mxu0 %v3602_v43  ;;  %3325 = vmatmul.mubr.bf16.vlgmr.msra.gmra.mrb[0].mxu1 %v2974_v14  ;;  %v773_v32 = vor.u32 %v772_v17, %v769_v62  ;;  %v1530_v34 = vshrl.u32 %v1465_v12, 16  ;;  %v1533_v3 = vshll.u32 %v1465_v12, 16 }
 0x167   : > { %v786_v33 = vrot.slane %v784_v21, 5  ;;  %3242 = vmatprep.subr.bf16.mxu0 %v3605_v58  ;;  %3333 = vmatpush3.bf16.msra.mxu1 %v4079_v2  ;;  %v792_v40 = vrot.slane %v790_v30, 5  ;;  %v1539_v44 = vshll.u32 %v4233_v13, 16  ;;  %v1544_v1 = vshrl.u32 %v1467_v22, 16  ;;  %v1471_v2 = vld [vmem:[#allocation2 + $0x40] sm:$0xf] }
 0x168   : > { %v765_v39 = vsel %vm4157_vm10, %v760_v41, %v764_v59  ;;  %3334 = vmatprep.subr.bf16.mxu1 %v3601_v15  ;;  %v774_v46 = vrot.slane %v773_v32, 4  ;;  %v1532_v23 = vrot.slane %v1530_v34, 4  ;;  %v1535_v53 = vrot.slane %v1533_v3, 5  ;;  %v3606_v21 = vld [vmem:[#allocation6 + $0x158] sm:$0xff]   ;;  %v1739_v30 = vld [vmem:[#allocation2 + $0x10] sm:$0xe] }
 0x169   : > { %v2919_v43 = vcombine.low %v751_v25, %v765_v39  ;;  %v787_v26 = vor.u32 %v786_v33, %v783_v16  ;;  %v1546_v54 = vrot.slane %v1544_v1, 4  ;;  %v1547_v55 = vshll.u32 %v1467_v22, 16  ;;  %v3611_v3 = vld [vmem:[#allocation6 + $0x30] sm:$0xff]  }
 0x16a   : > { %3243 = vmatpush3.bf16.msra.mxu0 %v3605_v58  ;;  %v779_v56 = vsel %vm4157_vm10, %v774_v46, %v778_v18  ;;  %v1541_v62 = vrot.slane %v1539_v44, 5  ;;  %v1553_v63 = vshll.u32 %v4239_v31, 16  ;;  %v1536_v6 = vor.u32 %v1535_v53, %v1532_v23 }
 0x16b   : > { %3232 = vmatprep.mubr.bf16.mxu0 %v2919_v43  ;;  %v788_v59 = vrot.slane %v787_v26, 4  ;;  %3244 = vmatprep.subr.bf16.mxu0 %v3607_v37  ;;  %v1549_v9 = vrot.slane %v1547_v55, 5  ;;  %v1558_v11 = vshrl.u32 %v1469_v27, 16  ;;  %v1561_v12 = vshll.u32 %v1469_v27, 16  ;;  %v3613_v55 = vld [vmem:[#allocation6 + $0x38] sm:$0xff]  }
 0x16c   : > { %3335 = vmatpush3.bf16.msra.mxu1 %v3601_v15  ;;  %v1555_v14 = vrot.slane %v1553_v63, 5  ;;  %v1567_v17 = vshll.u32 %v4245_v51, 16  ;;  %v1572_v18 = vshrl.u32 %v1471_v2, 16  ;;  %v1537_v25 = vrot.slane %v1536_v6, 4  ;;  %v3610_v63 = vld [vmem:[#allocation6 + $0x168] sm:$0xff]  }
 0x16d   : > { %v793_v58 = vsel %vm4157_vm10, %v788_v59, %v792_v40  ;;  %3336 = vmatprep.subr.bf16.mxu1 %v3603_v45  ;;  %v1550_v41 = vor.u32 %v1549_v9, %v1546_v54  ;;  %v1560_v16 = vrot.slane %v1558_v11, 4  ;;  %v2929_v15 = vcombine.low %v4087_v5, %v4136_v47  ;;  %v1738_v5 = vld [vmem:[#allocation2 + $0x8] sm:$0xe]  ;;  %v3608_v47 = vld [vmem:[#allocation6 + $0x160] sm:$0xff]   ;;  %v1079_v11 = vld [vmem:[#allocation2 + $0x18] sm:$0xe] }
 0x16e   : > { %v2920_v22 = vcombine.low %v779_v56, %v793_v58  ;;  %3245 = vmatpush3.bf16.msra.mxu0 %v3607_v37  ;;  %v1563_v32 = vrot.slane %v1561_v12, 5  ;;  %v1574_v33 = vrot.slane %v1572_v18, 4  ;;  %v1575_v34 = vshll.u32 %v1471_v2, 16  ;;  %v1078_v9 = vld [vmem:[#allocation2 + $0x10] sm:$0xe]  ;;  %v3612_v18 = vld [vmem:[#allocation6 + $0x170] sm:$0xff]  }
 0x16f   : > { %3246 = vmatprep.subr.bf16.mxu0 %v3609_v4  ;;  %v1542_v39 = vsel %vm4157_vm10, %v1537_v25, %v1541_v62  ;;  %v1551_v40 = vrot.slane %v1550_v41, 4  ;;  %v1581_v44 = vshll.u32 %v4250_v0, 16  ;;  %v1569_v37 = vrot.slane %v1567_v17, 5  ;;  %v3669_v62 = vld [vmem:[%s4513_s5 + $0x18] sm:$0xff]  }
 0x170   : > { %3233 = vmatmul.mubr.bf16.gmra.mrb[12].mxu0 %v2920_v22  ;;  %3337 = vmatpush3.bf16.msra.mxu1 %v3603_v45  ;;  %v1564_v1 = vor.u32 %v1563_v32, %v1560_v16  ;;  %v1577_v43 = vrot.slane %v1575_v34, 5  ;;  %v1768_v46 = vrot.slane %v4182_v36, 5  ;;  %v2986_v23 = vrot.slane %v1739_v30, 9  ;;  %v1741_v30 = vld [vmem:[#allocation2 + $0x20] sm:$0xe] }
 0x171   : > { %3252 = vmatprep.mubr.bf16.mxu0 %v2929_v15  ;;  %3338 = vmatprep.subr.bf16.mxu1 %v3606_v21  ;;  %v1556_v26 = vsel %vm4157_vm10, %v1551_v40, %v1555_v14  ;;  %v1583_v45 = vrot.slane %v1581_v44, 5  ;;  %v1764_v2 = vrot.slane %v4178_v28, 5  ;;  %v2985_v56 = vrot.slane %v1738_v5, 9  ;;  %v3616_v28 = vld [vmem:[#allocation6 + $0x80] sm:$0xff]   ;;  %v1076_v14 = vld [vmem:[#allocation2] sm:$0xe] }
 0x172   : > { %3247 = vmatpush3.bf16.msra.mxu0 %v3609_v4  ;;  %v2975_v27 = vcombine.low %v1542_v39, %v1556_v26  ;;  %v1565_v53 = vrot.slane %v1564_v1, 4  ;;  %v1578_v54 = vor.u32 %v1577_v43, %v1574_v33  ;;  %v1769_v4 = vsel %vm4268_vm13, %v2986_v23, %v1768_v46  ;;  %v3619_v15 = vld [vmem:[#allocation6 + $0x88] sm:$0xff]   ;;  %v1742_v34 = vld [vmem:[#allocation2 + $0x28] sm:$0xe] }
 0x173   : > { %3248 = vmatprep.subr.bf16.mxu0 %v3611_v3  ;;  %v1765_v58 = vsel %vm4268_vm13, %v2985_v56, %v1764_v2  ;;  %v2943_v22 = vrot.slane %v1078_v9, 9  ;;  %v1113_v25 = vrot.slane %v4161_v8, 5  ;;  %v2944_v41 = vrot.slane %v1079_v11, 9  ;;  %v3614_v40 = vld [vmem:[#allocation6 + $0x178] sm:$0xff]   ;;  %v3623_v9 = vld [vmem:[#allocation6 + $0x190] sm:$0xff]  }
 0x174   : > { %3339 = vmatpush3.bf16.msra.mxu1 %v3606_v21  ;;  %3328 = vmatprep.mubr.bf16.mxu1 %v2975_v27  ;;  %v1570_v59 = vsel %vm4157_vm10, %v1565_v53, %v1569_v37  ;;  %v1579_v36 = vrot.slane %v1578_v54, 4  ;;  %v2993_v17 = vcombine.low %v1765_v58, %v1769_v4  ;;  %v1077_v21 = vld [vmem:[#allocation2 + $0x8] sm:$0xe]  ;;  %v2930_v16 = vcombine.low %v4150_v57, %v4134_v42  ;;  %v1740_v42 = vld [vmem:[#allocation2 + $0x18] sm:$0xe] }
 0x175   : > { %3340 = vmatprep.subr.bf16.mxu1 %v3608_v47  ;;  %v1117_v32 = vrot.slane %v4172_v19, 5  ;;  %v2931_v33 = vcombine.low %v4197_v10, %v4204_v29  ;;  %v2941_v39 = vrot.slane %v1076_v14, 9  ;;  %v4286_v8 = vsel %vm4268_vm13, %v2943_v22, %v1113_v25  ;;  %v1744_v53 = vld [vmem:[#allocation2 + $0x38] sm:$0xe]  ;;  %v3633_v22 = vld [vmem:[#allocation6 + $0xb8] sm:$0xff]  }
 0x176   : > { %3249 = vmatpush3.bf16.msra.mxu0 %v3611_v3  ;;  %v1584_v6 = vsel %vm4157_vm10, %v1579_v36, %v1583_v45  ;;  %v1743_v3 = vld [vmem:[#allocation2 + $0x30] sm:$0xe]  ;;  %v1105_v57 = vrot.slane %v4095_v20, 5  ;;  %v2942_v44 = vrot.slane %v1077_v21, 9  ;;  %v1109_v19 = vrot.slane %v4146_v52, 5  ;;  %v3622_v52 = vld [vmem:[#allocation6 + $0x90] sm:$0xff]  }
 0x177   : > { %3250 = vmatprep.subr.bf16.mxu0 %v3613_v55  ;;  %v2976_v12 = vcombine.low %v1570_v59, %v1584_v6  ;;  %v4292_v1 = vsel %vm4268_vm13, %v2944_v41, %v1117_v32  ;;  %v1776_v10 = vrot.slane %v4192_v60, 5  ;;  %v2988_v29 = vrot.slane %v1741_v30, 9  ;;  %v3618_v60 = vld [vmem:[#allocation6 + $0x180] sm:$0xff]   ;;  %v1745_v45 = vld [vmem:[#allocation2 + $0x40] sm:$0xe]  ;;  %v3620_v36 = vld [vmem:[#allocation6 + $0x188] sm:$0xff]  }
 0x178   : > { %3341 = vmatpush3.bf16.msra.mxu1 %v3608_v47  ;;  %v2950_v37 = vcombine.low %v4286_v8, %v4292_v1  ;;  %v2989_v43 = vrot.slane %v1742_v34, 9  ;;  %v1780_v5 = vrot.slane %v4233_v13, 5  ;;  %v2990_v47 = vrot.slane %v1743_v3, 9  ;;  %v3629_v58 = vld [vmem:[#allocation6 + $0xa8] sm:$0xff]   ;;  %v1081_v21 = vld [vmem:[#allocation2 + $0x28] sm:$0xe] }
 0x179   : > { %3342 = vmatprep.subr.bf16.mxu1 %v3610_v63  ;;  %3329 = vmatmul.mubr.bf16.gmra.mrb[4].mxu1 %v2976_v12  ;;  %v1784_v20 = vrot.slane %v4239_v31, 5  ;;  %v1772_v46 = vrot.slane %v4187_v49, 5  ;;  %v2987_v26 = vrot.slane %v1740_v42, 9  ;;  %v1106_v23 = vsel %vm4268_vm13, %v2941_v39, %v1105_v57  ;;  %v3624_v14 = vld [vmem:[#allocation2 + $0x10] ss:$8 sps:$4 sm:$0xff]   ;;  %v3632_v39 = vld [vmem:[#allocation6 + $0x1b0] sm:$0xff]  }
 0x17a   : > { %3251 = vmatpush3.bf16.msra.mxu0 %v3613_v55  ;;  %3348 = vmatprep.mubr.bf16.mxu1 %v2993_v17  ;;  %v1110_v27 = vsel %vm4268_vm13, %v2942_v44, %v1109_v19  ;;  %v1777_v13 = vsel %vm4268_vm13, %v2988_v29, %v1776_v10  ;;  %v1781_v31 = vsel %vm4268_vm13, %v2989_v43, %v1780_v5  ;;  %v3625_v55 = vld [vmem:[#allocation6 + $0x98] sm:$0xff]   ;;  %v2992_v6 = vrot.slane %v1745_v45, 9  ;;  %v3631_v17 = vld [vmem:[#allocation6 + $0xb0] sm:$0xff]   ;;  %v3630_v41 = vld [vmem:[#allocation6 + $0x1a8] sm:$0xff]  }
 0x17b   : > { %3260 = vmatprep.subr.bf16.mxu0 %v3616_v28  ;;  %v1785_v49 = vsel %vm4268_vm13, %v2990_v47, %v1784_v20  ;;  %v2932_v54 = vcombine.low %v4211_v35, %v4223_v50  ;;  %v1773_v2 = vsel %vm4268_vm13, %v2987_v26, %v1772_v46  ;;  %v2949_v56 = vcombine.low %v1106_v23, %v1110_v27  ;;  %v3627_v50 = vld [vmem:[#allocation6 + $0xa0] sm:$0xff]   ;;  %v1080_v25 = vld [vmem:[#allocation2 + $0x20] sm:$0xe]  ;;  %v1083_v42 = vld [vmem:[#allocation2 + $0x38] sm:$0xe] }
 0x17c   : > { %3343 = vmatpush3.bf16.msra.mxu1 %v3610_v63  ;;  %v2994_v59 = vcombine.low %v1773_v2, %v1777_v13  ;;  %v2991_v63 = vrot.slane %v1744_v53, 9  ;;  %v2995_v4 = vcombine.low %v1781_v31, %v1785_v49  ;;  %v1792_v35 = vrot.slane %v4250_v0, 5  ;;  %v3626_v0 = vld [vmem:[#allocation6 + $0x198] sm:$0xff]   ;;  %v1082_v34 = vld [vmem:[#allocation2 + $0x30] sm:$0xe]  ;;  %v3639_v44 = vld [vmem:[#allocation6 + $0xc8] sm:$0xff]  }
 0x17d   : > { %3344 = vmatprep.subr.bf16.mxu1 %v3612_v18  ;;  %3253 = vmatmul.mubr.bf16.vlgmr.msra.gmra.mrb[8].mxu0 %v2930_v16  ;;  %v2946_v16 = vrot.slane %v1081_v21, 9  ;;  %v1125_v30 = vrot.slane %v4213_v38, 5  ;;  %v2945_v32 = vrot.slane %v1080_v25, 9  ;;  %v2117_v3 = vld [vmem:[#allocation2 + $0x10] sm:$0xf]  ;;  %v2947_v19 = vrot.slane %v1082_v34, 9 }
 0x17e   : > { %3256 = vmatprep.mubr.bf16.mxu0 %v2931_v33  ;;  %3261 = vmatpush3.bf16.msra.mxu0 %v3616_v28  ;;  %v1788_v28 = vrot.slane %v4245_v51, 5  ;;  %v1793_v12 = vsel %vm4268_vm13, %v2992_v6, %v1792_v35  ;;  %v1121_v33 = vrot.slane %v4200_v24, 5  ;;  %v2119_v57 = vld [vmem:[#allocation2 + $0x18] sm:$0xf]  ;;  %v2134_v10 = vshrl.u32 %v2117_v3, 16  ;;  %v3634_v20 = vld [vmem:[#allocation6 + $0x1b8] sm:$0xff]  }
 0x17f   : > { %3262 = vmatprep.subr.bf16.mxu0 %v3619_v15  ;;  %v2137_v29 = vshll.u32 %v2117_v3, 16  ;;  %v1129_v43 = vrot.slane %v4218_v48, 5  ;;  %v2948_v5 = vrot.slane %v1083_v42, 9  ;;  %v1133_v47 = vrot.slane %v4226_v61, 5  ;;  %v3641_v26 = vld [vmem:[#allocation6 + $0xd0] sm:$0xff]   ;;  %v3637_v27 = vld [vmem:[#allocation6 + $0x1c0] sm:$0xff]  }
 0x180   : > { %3345 = vmatpush3.bf16.msra.mxu1 %v3612_v18  ;;  %v1789_v11 = vsel %vm4268_vm13, %v2991_v63, %v1788_v28  ;;  %v3628_v18 = vld [vmem:[#allocation6 + $0x1a0] sm:$0xff]   ;;  %v1122_v38 = vsel %vm4268_vm13, %v2945_v32, %v1121_v33  ;;  %v2151_v46 = vshll.u32 %v2119_v57, 16  ;;  %v3645_v31 = vld [vmem:[#allocation6 + $0xd8] sm:$0xff]   ;;  %v3644_v28 = vld [vmem:[#allocation6 + $0x1d0] sm:$0xff]  }
 0x181   : > { %3346 = vmatprep.subr.bf16.mxu1 %v3614_v40  ;;  %v2996_v51 = vcombine.low %v1789_v11, %v1793_v12  ;;  %v2139_v23 = vrot.slane %v2137_v29, 5  ;;  %v1130_v48 = vsel %vm4268_vm13, %v2947_v19, %v1129_v43  ;;  %v1134_v61 = vsel %vm4268_vm13, %v2948_v5, %v1133_v47  ;;  %v4335_v1 = vld [vmem:[#allocation2 + $0x14] sm:$0x1]  ;;  %v3642_v49 = vld [vmem:[#allocation2 + $0x8] ss:$8 sps:$4 sm:$0xff]   ;;  %v3649_v11 = vld [vmem:[#allocation6 + $0xe8] sm:$0xff]  }
 0x182   : > { %3263 = vmatpush3.bf16.msra.mxu0 %v3619_v15  ;;  %v3635_v15 = vld [vmem:[#allocation6 + $0xc0] sm:$0xff]   ;;  %v2153_v8 = vrot.slane %v2151_v46, 5  ;;  %v3636_v45 = vld [vmem:[#allocation2 + $0x20] ss:$8 sps:$4 sm:$0xff]   ;;  %v2143_v2 = vshll.u32 %v4335_v1, 16 }
 0x183   : > { %3264 = vmatprep.subr.bf16.mxu0 %v3622_v52  ;;  %v3643_v12 = vld [vmem:[#allocation2 + $0x40] ss:$8 sps:$4 sm:$0xff]   ;;  %v2127_v21 = vld [vmem:[#allocation2 + $0x38] sm:$0xf]  ;;  %v4345_v46 = vld [vmem:[#allocation2 + $0x24] sm:$0x1] }
 0x184   : > { %3347 = vmatpush3.bf16.msra.mxu1 %v3614_v40  ;;  %v1126_v40 = vsel %vm4268_vm13, %v2946_v16, %v1125_v30  ;;  %v2145_v6 = vrot.slane %v2143_v2, 5  ;;  %v2121_v25 = vld [vmem:[#allocation2 + $0x20] sm:$0xf]  ;;  %v3653_v30 = vld [vmem:[#allocation6 + $0xf8] sm:$0xff]   ;;  %v2204_v33 = vshrl.u32 %v2127_v21, 16  ;;  %v2207_v34 = vshll.u32 %v2127_v21, 16 }
 0x185   : > { %3356 = vmatprep.subr.bf16.mxu1 %v3618_v60  ;;  %3257 = vmatmul.mubr.bf16.gmra.mrb[12].mxu0 %v2932_v54  ;;  %v2951_v24 = vcombine.low %v1122_v38, %v1126_v40  ;;  %v4337_v54 = vld [vmem:[#allocation2 + $0x1c] sm:$0x1]  ;;  %v2162_v3 = vshrl.u32 %v2121_v25, 16  ;;  %v2131_v42 = vld [vmem:[#allocation2 + $0x48] sm:$0xf]  ;;  %v3652_v43 = vld [vmem:[#allocation6 + $0x1f0] sm:$0xff]  }
 0x186   : > { %3265 = vmatpush3.bf16.msra.mxu0 %v3622_v52  ;;  %3276 = vmatprep.mubr.bf16.mxu0 %v2949_v56  ;;  %v2148_v52 = vshrl.u32 %v2119_v57, 16  ;;  %v2157_v63 = vshll.u32 %v4337_v54, 16  ;;  %v3650_v40 = vld [vmem:[#allocation6 + $0x1e8] sm:$0xff]   ;;  %v2209_v29 = vrot.slane %v2207_v34, 5  ;;  %v3654_v2 = vld [vmem:[#allocation6 + $0x1f8] sm:$0xff]  }
 0x187   : > { %3349 = vmatmul.mubr.bf16.vlgmr.msra.gmra.mrb[0].mxu1 %v2994_v59  ;;  %3266 = vmatprep.subr.bf16.mxu0 %v3625_v55  ;;  %v3638_v59 = vld [vmem:[#allocation2 + $0x30] ss:$8 sps:$4 sm:$0xff]   ;;  %v2164_v5 = vrot.slane %v2162_v3, 4 }
 0x188   : > { %3352 = vmatprep.mubr.bf16.mxu1 %v2995_v4  ;;  %3357 = vmatpush3.bf16.msra.mxu1 %v3618_v60  ;;  %v2136_v60 = vrot.slane %v2134_v10, 4  ;;  %v2150_v13 = vrot.slane %v2148_v52, 4  ;;  %v3647_v4 = vld [vmem:[#allocation6 + $0xe0] sm:$0xff]   ;;  %v2206_v10 = vrot.slane %v2204_v33, 4  ;;  %v2235_v52 = vshll.u32 %v2131_v42, 16  ;;  %v3658_v34 = vld [vmem:[#allocation6 + $0x208] sm:$0xff]  }
 0x189   : > { %3358 = vmatprep.subr.bf16.mxu1 %v3620_v36 }
 0x18a   : > { %3267 = vmatpush3.bf16.msra.mxu0 %v3625_v55  ;;  %v2140_v53 = vor.u32 %v2139_v23, %v2136_v60  ;;  %v3640_v55 = vld [vmem:[#allocation6 + $0x1c8] sm:$0xff]   ;;  %v2154_v56 = vor.u32 %v2153_v8, %v2150_v13  ;;  %v4349_v60 = vld [vmem:[#allocation2 + $0x34] sm:$0x1] }
 0x18b   : > { %3268 = vmatprep.subr.bf16.mxu0 %v3627_v50  ;;  %v3655_v8 = vld [vmem:[#allocation2 + $0x18] ss:$8 sps:$4 sm:$0xff]  }
 0x18c   : > { %3359 = vmatpush3.bf16.msra.mxu1 %v3620_v36  ;;  %v2141_v36 = vrot.slane %v2140_v53, 4  ;;  %v2155_v35 = vrot.slane %v2154_v56, 4  ;;  %v2199_v53 = vshll.u32 %v4349_v60, 16  ;;  %v2171_v56 = vshll.u32 %v4345_v46, 16 }
 0x18d   : > { %3360 = vmatprep.subr.bf16.mxu1 %v3623_v9 }
 0x18e   : > { %3269 = vmatpush3.bf16.msra.mxu0 %v3627_v50  ;;  %v2146_v50 = vsel %vm4157_vm10, %v2141_v36, %v2145_v6  ;;  %v2237_v36 = vrot.slane %v2235_v52, 5  ;;  %v3661_v52 = vld [vmem:[#allocation6 + $0x218] sm:$0xff]  }
 0x18f   : > { %3353 = vmatmul.mubr.bf16.gmra.mrb[4].mxu1 %v2996_v51  ;;  %3270 = vmatprep.subr.bf16.mxu0 %v3629_v58  ;;  %v3646_v51 = vld [vmem:[#allocation6 + $0x1d8] sm:$0xff]  }
 0x190   : > { %3361 = vmatpush3.bf16.msra.mxu1 %v3623_v9  ;;  %3372 = vmatprep.mubr.bf16.mxu1 %v3624_v14  ;;  %v2159_v9 = vrot.slane %v2157_v63, 5  ;;  %v3651_v14 = vld [vmem:[#allocation6 + $0xf0] sm:$0xff]  }
 0x191   : > { %3362 = vmatprep.subr.bf16.mxu1 %v3626_v0 }
 0x192   : > { %3271 = vmatpush3.bf16.msra.mxu0 %v3629_v58  ;;  %v2160_v58 = vsel %vm4157_vm10, %v2155_v35, %v2159_v9 }
 0x193   : > { %3272 = vmatprep.subr.bf16.mxu0 %v3631_v17 }
 0x194   : > { %3363 = vmatpush3.bf16.msra.mxu1 %v3626_v0  ;;  %v3017_v0 = vcombine.low %v2146_v50, %v2160_v58  ;;  %v2201_v50 = vrot.slane %v2199_v53, 5  ;;  %v4357_v58 = vld [vmem:[#allocation2 + $0x4c] sm:$0x1]  ;;  %v2400_v53 = vld [vmem:[#allocation2 + $0x20] sm:$0xe] }
 0x195   : > { %3364 = vmatprep.subr.bf16.mxu1 %v3628_v18 }
 0x196   : > { %3273 = vmatpush3.bf16.msra.mxu0 %v3631_v17  ;;  %v2123_v17 = vld [vmem:[#allocation2 + $0x28] sm:$0xf] }
 0x197   : > { %3274 = vmatprep.subr.bf16.mxu0 %v3633_v22  ;;  %v2179_v16 = vshll.u32 %v2123_v17, 16 }
 0x198   : > { %3365 = vmatpush3.bf16.msra.mxu1 %v3628_v18  ;;  %v2125_v18 = vld [vmem:[#allocation2 + $0x30] sm:$0xf] }
 0x199   : > { %3366 = vmatprep.subr.bf16.mxu1 %v3630_v41  ;;  %v2193_v32 = vshll.u32 %v2125_v18, 16  ;;  %v2181_v38 = vrot.slane %v2179_v16, 5 }
 0x19a   : > { %3275 = vmatpush3.bf16.msra.mxu0 %v3633_v22  ;;  %v3648_v22 = vld [vmem:[#allocation6 + $0x1e0] sm:$0xff]  }
 0x19b   : > { %3284 = vmatprep.subr.bf16.mxu0 %v3635_v15  ;;  %v2195_v19 = vrot.slane %v2193_v32, 5  ;;  %v2398_v32 = vld [vmem:[#allocation2 + $0x10] sm:$0xe] }
 0x19c   : > { %3367 = vmatpush3.bf16.msra.mxu1 %v3630_v41  ;;  %v2176_v41 = vshrl.u32 %v2123_v17, 16  ;;  %v2241_v17 = vshll.u32 %v4357_v58, 16 }
 0x19d   : > { %3368 = vmatprep.subr.bf16.mxu1 %v3632_v39  ;;  %3277 = vmatmul.mubr.bf16.vlgmr.msra.gmra.mrb[8].mxu0 %v2950_v37  ;;  %v2952_v37 = vcombine.low %v1130_v48, %v1134_v61  ;;  %v4352_v61 = vld [vmem:[#allocation2 + $0x3c] sm:$0x1] }
 0x19e   : > { %3280 = vmatprep.mubr.bf16.mxu0 %v2951_v24  ;;  %3285 = vmatpush3.bf16.msra.mxu0 %v3635_v15  ;;  %v2190_v15 = vshrl.u32 %v2125_v18, 16  ;;  %v2178_v57 = vrot.slane %v2176_v41, 4  ;;  %v2129_v24 = vld [vmem:[#allocation2 + $0x40] sm:$0xf]  ;;  %v2173_v18 = vrot.slane %v2171_v56, 5  ;;  %v2444_v56 = vrot.slane %v4352_v61, 5 }
 0x19f   : > { %3286 = vmatprep.subr.bf16.mxu0 %v3639_v44  ;;  %v2221_v13 = vshll.u32 %v2129_v24, 16 }
 0x1a0   : > { %3369 = vmatpush3.bf16.msra.mxu1 %v3632_v39  ;;  %v2165_v39 = vshll.u32 %v2121_v25, 16  ;;  %v2182_v23 = vor.u32 %v2181_v38, %v2178_v57  ;;  %v2243_v57 = vrot.slane %v2241_v17, 5  ;;  %v2399_v38 = vld [vmem:[#allocation2 + $0x18] sm:$0xe]  ;;  %v3666_v17 = vld [vmem:[%s4513_s5] sm:$0xff]  }
 0x1a1   : > { %3370 = vmatprep.subr.bf16.mxu1 %v3634_v20  ;;  %v2223_v6 = vrot.slane %v2221_v13, 5  ;;  %v2402_v13 = vld [vmem:[#allocation2 + $0x30] sm:$0xe] }
 0x1a2   : > { %3287 = vmatpush3.bf16.msra.mxu0 %v3639_v44  ;;  %v2192_v44 = vrot.slane %v2190_v15, 4  ;;  %v2167_v47 = vrot.slane %v2165_v39, 5  ;;  %v2183_v63 = vrot.slane %v2182_v23, 4 }
 0x1a3   : > { %3288 = vmatprep.subr.bf16.mxu0 %v3641_v26 }
 0x1a4   : > { %3371 = vmatpush3.bf16.msra.mxu1 %v3634_v20  ;;  %v2232_v20 = vshrl.u32 %v2131_v42, 16 }
 0x1a5   : > { %3380 = vmatprep.subr.bf16.mxu1 %v3637_v27  ;;  %3281 = vmatmul.mubr.bf16.gmra.mrb[12].mxu0 %v2952_v37  ;;  %v2196_v37 = vor.u32 %v2195_v19, %v2192_v44  ;;  %v3029_v44 = vrot.slane %v2398_v32, 9  ;;  %v2424_v19 = vrot.slane %v4335_v1, 5 }
 0x1a6   : > { %3289 = vmatpush3.bf16.msra.mxu0 %v3641_v26  ;;  %3300 = vmatprep.mubr.bf16.mxu0 %v3642_v49  ;;  %v4347_v26 = vld [vmem:[#allocation2 + $0x2c] sm:$0x1]  ;;  %v2213_v49 = vshll.u32 %v4352_v61, 16 }
 0x1a7   : > { %3373 = vmatmul.mubr.bf16.vlgmr.msra.gmra.mrb[0].mxu1 %v3636_v45  ;;  %3290 = vmatprep.subr.bf16.mxu0 %v3645_v31  ;;  %v2185_v48 = vshll.u32 %v4347_v26, 16  ;;  %v3656_v45 = vld [vmem:[#allocation2 + $0x28] ss:$8 sps:$4 sm:$0xff]   ;;  %v2197_v35 = vrot.slane %v2196_v37, 4 }
 0x1a8   : > { %3376 = vmatprep.mubr.bf16.mxu1 %v3638_v59  ;;  %3381 = vmatpush3.bf16.msra.mxu1 %v3637_v27  ;;  %v2218_v27 = vshrl.u32 %v2129_v24, 16  ;;  %v2234_v59 = vrot.slane %v2232_v20, 4  ;;  %v2428_v24 = vrot.slane %v4337_v54, 5  ;;  %v3662_v54 = vld [vmem:[#allocation6 + $0x220] sm:$0xff]   ;;  %v3665_v37 = vld [vmem:[#allocation6 + $0x238] sm:$0xff]  }
 0x1a9   : > { %3382 = vmatprep.subr.bf16.mxu1 %v3640_v55  ;;  %v2202_v41 = vsel %vm4157_vm10, %v2197_v35, %v2201_v50 }
 0x1aa   : > { %3291 = vmatpush3.bf16.msra.mxu0 %v3645_v31  ;;  %v2210_v31 = vor.u32 %v2209_v29, %v2206_v10  ;;  %v3660_v10 = vld [vmem:[#allocation6 + $0x210] sm:$0xff]   ;;  %v3030_v29 = vrot.slane %v2399_v38, 9 }
 0x1ab   : > { %3292 = vmatprep.subr.bf16.mxu0 %v3647_v4 }
 0x1ac   : > { %3383 = vmatpush3.bf16.msra.mxu1 %v3640_v55  ;;  %v2168_v55 = vor.u32 %v2167_v47, %v2164_v5  ;;  %v2211_v9 = vrot.slane %v2210_v31, 4  ;;  %v2425_v47 = vsel %vm4268_vm13, %v3029_v44, %v2424_v19  ;;  %v2429_v1 = vsel %vm4268_vm13, %v3030_v29, %v2428_v24 }
 0x1ad   : > { %3384 = vmatprep.subr.bf16.mxu1 %v3644_v28  ;;  %v3037_v23 = vcombine.low %v2425_v47, %v2429_v1 }
 0x1ae   : > { %3293 = vmatpush3.bf16.msra.mxu0 %v3647_v4  ;;  %v2187_v4 = vrot.slane %v2185_v48, 5  ;;  %v3664_v48 = vld [vmem:[#allocation6 + $0x230] sm:$0xff]  }
 0x1af   : > { %3377 = vmatmul.mubr.bf16.gmra.mrb[4].mxu1 %v3643_v12  ;;  %3294 = vmatprep.subr.bf16.mxu0 %v3649_v11  ;;  %v2169_v12 = vrot.slane %v2168_v55, 4  ;;  %v2440_v55 = vrot.slane %v4349_v60, 5 }
 0x1b0   : > { %3385 = vmatpush3.bf16.msra.mxu1 %v3644_v28  ;;  %3396 = vmatprep.mubr.bf16.mxu1 %v3017_v0  ;;  %v2220_v28 = vrot.slane %v2218_v27, 4  ;;  %v4359_v0 = vld [vmem:[#allocation2 + $0x44] sm:$0x1]  ;;  %v2188_v21 = vsel %vm4157_vm10, %v2183_v63, %v2187_v4  ;;  %v2401_v27 = vld [vmem:[#allocation2 + $0x28] sm:$0xe] }
 0x1b1   : > { %3386 = vmatprep.subr.bf16.mxu1 %v3646_v51  ;;  %v2227_v25 = vshll.u32 %v4359_v0, 16  ;;  %v2174_v15 = vsel %vm4157_vm10, %v2169_v12, %v2173_v18  ;;  %v3032_v31 = vrot.slane %v2401_v27, 9  ;;  %v2405_v4 = vld [vmem:[#allocation2 + $0x48] sm:$0xe]  ;;  %v3670_v18 = vld [vmem:[%s4513_s5 + $0x20] sm:$0xff]  }
 0x1b2   : > { %3295 = vmatpush3.bf16.msra.mxu0 %v3649_v11  ;;  %v2215_v11 = vrot.slane %v2213_v49, 5  ;;  %v3018_v33 = vcombine.low %v2174_v15, %v2188_v21  ;;  %v2436_v49 = vrot.slane %v4347_v26, 5  ;;  %v3036_v35 = vrot.slane %v2405_v4, 9  ;;  %v3671_v21 = vld [vmem:[%s4513_s5 + $0x28] sm:$0xff]  }
 0x1b3   : > { %3296 = vmatprep.subr.bf16.mxu0 %v3651_v14  ;;  %v2229_v42 = vrot.slane %v2227_v25, 5  ;;  %v3673_v25 = vld [vmem:[%s4513_s5 + $0x38] sm:$0xff]  }
 0x1b4   : > { %3387 = vmatpush3.bf16.msra.mxu1 %v3646_v51  ;;  %v3657_v51 = vld [vmem:[#allocation6 + $0x200] sm:$0xff]   ;;  %v2216_v16 = vsel %vm4157_vm10, %v2211_v9, %v2215_v11  ;;  %v2437_v63 = vsel %vm4268_vm13, %v3032_v31, %v2436_v49  ;;  %v2448_v9 = vrot.slane %v4359_v0, 5  ;;  %v2452_v11 = vrot.slane %v4357_v58, 5  ;;  %v3667_v0 = vld [vmem:[%s4513_s5 + $0x8] sm:$0xff]  }
 0x1b5   : > { %3388 = vmatprep.subr.bf16.mxu1 %v3648_v22  ;;  %v3019_v39 = vcombine.low %v2202_v41, %v2216_v16  ;;  %v3668_v58 = vld [vmem:[%s4513_s5 + $0x10] sm:$0xff]  }
 0x1b6   : > { %3297 = vmatpush3.bf16.msra.mxu0 %v3651_v14  ;;  %v2238_v14 = vor.u32 %v2237_v36, %v2234_v59  ;;  %v3031_v59 = vrot.slane %v2400_v53, 9  ;;  %v2432_v36 = vrot.slane %v4345_v46, 5 }
 0x1b7   : > { %3298 = vmatprep.subr.bf16.mxu0 %v3653_v30 }
 0x1b8   : > { %3389 = vmatpush3.bf16.msra.mxu1 %v3648_v22  ;;  %v2224_v22 = vor.u32 %v2223_v6, %v2220_v28  ;;  %v2239_v3 = vrot.slane %v2238_v14, 4  ;;  %v2404_v6 = vld [vmem:[#allocation2 + $0x40] sm:$0xe]  ;;  %v2433_v60 = vsel %vm4268_vm13, %v3031_v59, %v2432_v36 }
 0x1b9   : > { %3390 = vmatprep.subr.bf16.mxu1 %v3650_v40  ;;  %v3038_v61 = vcombine.low %v2433_v60, %v2437_v63  ;;  %v3035_v46 = vrot.slane %v2404_v6, 9  ;;  %v3050_v6 = vld [vmem:[%s4514_s6] ss:$0 sm:$0xff] }
 0x1ba   : > { %3299 = vmatpush3.bf16.msra.mxu0 %v3653_v30  ;;  %v3659_v30 = vld [vmem:[#allocation2 + $0x38] ss:$8 sps:$4 sm:$0xff]   ;;  %v2244_v5 = vsel %vm4157_vm10, %v2239_v3, %v2243_v57 }
 0x1bb   : > { %v2449_v12 = vsel %vm4268_vm13, %v3035_v46, %v2448_v9  ;;  %3428 = vmatprep.subr.bf16.mxu0 %v3666_v17  ;;  %v3674_v9 = vld [vmem:[%s4007_s11 + $0x10] sm:$0xff] }
 0x1bc   : > { %3391 = vmatpush3.bf16.msra.mxu1 %v3650_v40  ;;  %v2225_v40 = vrot.slane %v2224_v22, 4  ;;  %v3672_v22 = vld [vmem:[%s4513_s5 + $0x30] sm:$0xff]  }
 0x1bd   : > { %3392 = vmatprep.subr.bf16.mxu1 %v3652_v43  ;;  %3301 = vmatmul.mubr.bf16.vlgmr.msra.gmra.mrb[8].mxu0 %v3655_v8  ;;  %v2403_v8 = vld [vmem:[#allocation2 + $0x38] sm:$0xe] }
 0x1be   : > { %3304 = vmatprep.mubr.bf16.mxu0 %v3656_v45  ;;  %v3033_v45 = vrot.slane %v2402_v13, 9  ;;  %3429 = vmatpush3.bf16.msra.mxu0 %v3666_v17 }
 0x1bf   : > { %3430 = vmatprep.subr.bf16.mxu0 %v3667_v0 }
 0x1c0   : > { %3393 = vmatpush3.bf16.msra.mxu1 %v3652_v43  ;;  %v2230_v43 = vsel %vm4157_vm10, %v2225_v40, %v2229_v42  ;;  %v2441_v28 = vsel %vm4268_vm13, %v3033_v45, %v2440_v55  ;;  %v3049_v40 = vld [vmem:[%s4512_s4] ss:$0 sm:$0xff] }
 0x1c1   : > { %3394 = vmatprep.subr.bf16.mxu1 %v3654_v2  ;;  %v3020_v20 = vcombine.low %v2230_v43, %v2244_v5 }
 0x1c2   : > { %3431 = vmatpush3.bf16.msra.mxu0 %v3667_v0 }
 0x1c3   : > { %3432 = vmatprep.subr.bf16.mxu0 %v3668_v58 }
 0x1c4   : > { %3395 = vmatpush3.bf16.msra.mxu1 %v3654_v2  ;;  %v3034_v2 = vrot.slane %v2403_v8, 9 }
 0x1c5   : > { %3404 = vmatprep.subr.bf16.mxu1 %v3657_v51  ;;  %3305 = vmatmul.mubr.bf16.gmra.mrb[12].mxu0 %v3659_v30 }
 0x1c6   : > { %v2445_v26 = vsel %vm4268_vm13, %v3034_v2, %v2444_v56  ;;  %3433 = vmatpush3.bf16.msra.mxu0 %v3668_v58 }
 0x1c7   : > { %3397 = vmatmul.mubr.bf16.vlgmr.msra.gmra.mrb[0].mxu1 %v3018_v33  ;;  %v3039_v50 = vcombine.low %v2441_v28, %v2445_v26  ;;  %3434 = vmatprep.subr.bf16.mxu0 %v3669_v62 }
 0x1c8   : > { %3400 = vmatprep.mubr.bf16.mxu1 %v3019_v39  ;;  %3405 = vmatpush3.bf16.msra.mxu1 %v3657_v51  ;;  %v2453_v51 = vsel %vm4268_vm13, %v3036_v35, %v2452_v11 }
 0x1c9   : > { %3406 = vmatprep.subr.bf16.mxu1 %v3658_v34  ;;  %v3040_v14 = vcombine.low %v2449_v12, %v2453_v51 }
 0x1ca   : > { %3435 = vmatpush3.bf16.msra.mxu0 %v3669_v62  ;;  %v3676_v62 = vld [vmem:[%s4007_s11 + $0x18] sm:$0xff] }
 0x1cb   : > { %3436 = vmatprep.subr.bf16.mxu0 %v3670_v18 }
 0x1cc   : > { %3407 = vmatpush3.bf16.msra.mxu1 %v3658_v34 }
 0x1cd   : > { %3408 = vmatprep.subr.bf16.mxu1 %v3660_v10 }
 0x1ce   : > { %3437 = vmatpush3.bf16.msra.mxu0 %v3670_v18 }
 0x1cf   : > { %3401 = vmatmul.mubr.bf16.gmra.mrb[4].mxu1 %v3020_v20  ;;  %3438 = vmatprep.subr.bf16.mxu0 %v3671_v21 }
 0x1d0   : > { %3409 = vmatpush3.bf16.msra.mxu1 %v3660_v10  ;;  %3420 = vmatprep.mubr.bf16.mxu1 %v3037_v23 }
 0x1d1   : > { %3410 = vmatprep.subr.bf16.mxu1 %v3661_v52 }
 0x1d2   : > { %3439 = vmatpush3.bf16.msra.mxu0 %v3671_v21 }
 0x1d3   : > { %3440 = vmatprep.subr.bf16.mxu0 %v3672_v22 }
 0x1d4   : > { %3411 = vmatpush3.bf16.msra.mxu1 %v3661_v52 }
 0x1d5   : > { %3412 = vmatprep.subr.bf16.mxu1 %v3662_v54 }
 0x1d6   : > { %3441 = vmatpush3.bf16.msra.mxu0 %v3672_v22  ;;  %v3677_v22 = vld [vmem:[%s4007_s11 + $0x8] sm:$0xff] }
 0x1d7   : > { %3442 = vmatprep.subr.bf16.mxu0 %v3673_v25 }
 0x1d8   : > { %3413 = vmatpush3.bf16.msra.mxu1 %v3662_v54 }
 0x1d9   : > { %3414 = vmatprep.subr.bf16.mxu1 %v3663_v7 }
 0x1da   : > { %3443 = vmatpush3.bf16.msra.mxu0 %v3673_v25 }
 0x1dc   : > { %3415 = vmatpush3.bf16.msra.mxu1 %v3663_v7 }
 0x1dd   : > { %3416 = vmatprep.subr.bf16.mxu1 %v3664_v48 }
 0x1e0   : > { %3417 = vmatpush3.bf16.msra.mxu1 %v3664_v48 }
 0x1e1   : > { %3418 = vmatprep.subr.bf16.mxu1 %v3665_v37 }
 0x1e4   : > { %3419 = vmatpush3.bf16.msra.mxu1 %v3665_v37 }
 0x1e7   : > { %3421 = vmatmul.mubr.bf16.vlgmr.msra.gmra.mrb[0].mxu1 %v3038_v61 }
 0x1e8   : > { %3424 = vmatprep.mubr.bf16.mxu1 %v3039_v50 }
 0x1ef   : > { %3425 = vmatmul.mubr.bf16.gmra.mrb[4].mxu1 %v3040_v14  ;;  %v3675_v14 = vld [vmem:[%s4007_s11] sm:$0xff] }
 0x290   : > { %v3302_v41 = vpop.f32.mrb[8].mxu0 }
 0x291   : > { %v1418_v16 = vpop.f32.mrb[9].mxu0 }
 0x292   : > { %v3303_v30 = vpop.f32.mrb[10].mxu0 }
 0x293   : > { %v1421_v15 = vpop.f32.mrb[11].mxu0 }
 0x298   : > { %v3306_v32 = vpop.f32.mrb[12].mxu0 }
 0x299   : > { %v1434_v33 = vpop.f32.mrb[13].mxu0 }
 0x29a   : > { %v3307_v34 = vpop.f32.mrb[14].mxu0 }
 0x29b   : > { %v1437_v3 = vpop.f32.mrb[15].mxu0 }
 0x2ba   : > { %v3422_v39 = vpop.f32.mrb[0].mxu1 }
 0x2bb   : > { %v3452_v42 = vadd.f32 %v3422_v39, %v3302_v41  ;;  %v2568_v57 = vpop.f32.mrb[1].mxu1 }
 0x2bc   : > { %v3453_v38 = vadd.f32 %v2568_v57, %v1418_v16  ;;  %v3423_v44 = vpop.f32.mrb[2].mxu1  ;;  %v3679_v57 = vld [vmem:[%s4007_s11 + $0x20] sm:$0xff] }
 0x2bd   : > { %v2616_v19 = vadd.f32 %v3452_v42, %v3049_v40  ;;  %v3454_v10 = vadd.f32 %v3423_v44, %v3303_v30  ;;  %v2571_v29 = vpop.f32.mrb[3].mxu1 }
 0x2be   : > { %v2614_v24 = vadd.f32 %v3453_v38, %v3049_v40  ;;  %v3455_v43 = vadd.f32 %v2571_v29, %v1421_v15 }
 0x2bf   : > { %v2617_v5 = vadd.f32 %v3454_v10, %v3049_v40  ;;  %v2624_v20 = vmax.f32 %v2616_v19, 0.0  ;;  %v3680_v10 = vld [vmem:[%s4007_s11 + $0x38] sm:$0xff] }
 0x2c0   : > { %v2615_v47 = vadd.f32 %v3455_v43, %v3049_v40  ;;  %v2622_v52 = vmax.f32 %v2614_v24, 0.0  ;;  %v3681_v43 = vld [vmem:[%s4007_s11 + $0x28] sm:$0xff] }
 0x2c1   : > { %v2625_v1 = vmax.f32 %v2617_v5, 0.0 }
 0x2c2   : > { %v2623_v23 = vmax.f32 %v2615_v47, 0.0  ;;  %v3426_v54 = vpop.f32.mrb[4].mxu1 }
 0x2c3   : > { %v2631_v7 = vpack.c.bf16 %v2625_v1, %v2624_v20  ;;  %v3456_v48 = vadd.f32 %v3426_v54, %v3306_v32  ;;  %v2584_v27 = vpop.f32.mrb[5].mxu1 }
 0x2c4   : > { %v3457_v13 = vadd.f32 %v2584_v27, %v1434_v33  ;;  %v3427_v8 = vpop.f32.mrb[6].mxu1  ;;  %v2630_v37 = vpack.c.bf16 %v2623_v23, %v2622_v52 }
 0x2c5   : > { %v2620_v53 = vadd.f32 %v3456_v48, %v3049_v40  ;;  %v3458_v31 = vadd.f32 %v3427_v8, %v3307_v34  ;;  %v2587_v49 = vpop.f32.mrb[7].mxu1 }
 0x2c6   : > { %v2618_v45 = vadd.f32 %v3457_v13, %v3049_v40  ;;  %v3459_v55 = vadd.f32 %v2587_v49, %v1437_v3  ;;  %3444 = vmatprep.mubr.bf16.mxu0 %v2630_v37  ;;  %v3678_v3 = vld [vmem:[%s4007_s11 + $0x30] sm:$0xff]  ;;  %s3740_s11 = scalar_lea.vmem %s4458_s29, 1024 }
 0x2c7   : > { %v2621_v2 = vadd.f32 %v3458_v31, %v3049_v40  ;;  %3445 = vmatmul.mubr.bf16.vlgmr.msra.gmra.mrb[16].mxu0 %v2631_v7  ;;  %v2628_v59 = vmax.f32 %v2620_v53, 0.0  ;;  %p3741_p4 = scmp.ne.s32.totalorder %s4458_s29, %s3740_s11  ;;  %p3748_p13 = scmp.lt.s32.totalorder %s3746_s9, %s3740_s11 }
 0x2c8   : > { %v2619_v56 = vadd.f32 %v3459_v55, %v3049_v40  ;;  %v2626_v63 = vmax.f32 %v2618_v45, 0.0 }
 0x2c9   : > { %v2629_v36 = vmax.f32 %v2621_v2, 0.0  ;;  %p3742_p6 = pnand %p3741_p4, %p3953_p12  ;;  %p3749_p3 = por %p3748_p13, %p3747_p10 }
 0x2ca   : > { %v2627_v4 = vmax.f32 %v2619_v56, 0.0 }
 0x2cb   : > { %v2633_v28 = vpack.c.bf16 %v2629_v36, %v2628_v59  ;;  %p3743_p8 = pneg %p3742_p6 }
 0x2cc   : > { %v2632_v26 = vpack.c.bf16 %v2627_v4, %v2626_v63 }
 0x2cd   : > { %p3750_p7 = pnand %p3749_p3, %p3743_p8 }
 0x2ce   : > { %3448 = vmatprep.mubr.bf16.mxu0 %v2632_v26 }
 0x2cf   : > { %3449 = vmatmul.mubr.bf16.gmra.mrb[20].mxu0 %v2633_v28 }
 0x39a   : > { %v3446_v60 = vpop.f32.mrb[16].mxu0 }
 0x39b   : > { %v2748_v61 = vadd.f32 %v3446_v60, %v3050_v6  ;;  %v2739_v35 = vpop.f32.mrb[17].mxu0 }
 0x39c   : > { %v2740_v50 = vadd.f32 %v3050_v6, %v2739_v35  ;;  %v3447_v46 = vpop.f32.mrb[18].mxu0 }
 0x39d   : > { %v2772_v11 = vadd.f32 %v3674_v9, %v2748_v61  ;;  %v2751_v12 = vadd.f32 %v3447_v46, %v3050_v6  ;;  %v2742_v51 = vpop.f32.mrb[19].mxu0 }
 0x39e   : > { %v2770_v17 = vadd.f32 %v3675_v14, %v2740_v50  ;;  %v2743_v0 = vadd.f32 %v3050_v6, %v2742_v51 }
 0x39f   : > { %v2780_v58 = vmax.f32 %v2772_v11, 0.0  ;;  %v2773_v18 = vadd.f32 %v3676_v62, %v2751_v12 }
 0x3a0   : > { %v2778_v21 = vmax.f32 %v2770_v17, 0.0  ;;  %v2771_v25 = vadd.f32 %v3677_v22, %v2743_v0 }
 0x3a1   : > { %2788 = vst.msk [vmem:[%s4435_s30 + $0x10] sm:$0xff] %vm348_vm0, %v2780_v58  ;;  %v2781_v41 = vmax.f32 %v2773_v18, 0.0 }
 0x3a2   : > { %2786 = vst.msk [vmem:[%s4435_s30] sm:$0xff] %vm348_vm0, %v2778_v21  ;;  %v2779_v16 = vmax.f32 %v2771_v25, 0.0  ;;  %v3450_v30 = vpop.f32.mrb[20].mxu0 }
 0x3a3   : > { %2789 = vst.msk [vmem:[%s4435_s30 + $0x18] sm:$0xff] %vm348_vm0, %v2781_v41  ;;  %v2764_v15 = vadd.f32 %v3450_v30, %v3050_v6  ;;  %v2755_v32 = vpop.f32.mrb[21].mxu0 }
 0x3a4   : > { %2787 = vst.msk [vmem:[%s4435_s30 + $0x8] sm:$0xff] %vm348_vm0, %v2779_v16  ;;  %v2756_v33 = vadd.f32 %v3050_v6, %v2755_v32  ;;  %v3451_v34 = vpop.f32.mrb[22].mxu0 }
 0x3a5   : > { %v2776_v39 = vadd.f32 %v3678_v3, %v2764_v15  ;;  %v2767_v40 = vadd.f32 %v3451_v34, %v3050_v6  ;;  %v2758_v42 = vpop.f32.mrb[23].mxu0 }
 0x3a6   : > { %v2774_v38 = vadd.f32 %v3679_v57, %v2756_v33  ;;  %v2759_v44 = vadd.f32 %v3050_v6, %v2758_v42 }
 0x3a7   : > { %v2784_v19 = vmax.f32 %v2776_v39, 0.0  ;;  %v2777_v29 = vadd.f32 %v3680_v10, %v2767_v40 }
 0x3a8   : > { %v2782_v24 = vmax.f32 %v2774_v38, 0.0  ;;  %v2775_v5 = vadd.f32 %v3681_v43, %v2759_v44 }
 0x3a9   : > { %2792 = vst.msk [vmem:[%s4435_s30 + $0x30] sm:$0xff] %vm348_vm0, %v2784_v19  ;;  %v2785_v47 = vmax.f32 %v2777_v29, 0.0 }
 0x3aa   : > { %2790 = vst.msk [vmem:[%s4435_s30 + $0x20] sm:$0xff] %vm348_vm0, %v2782_v24  ;;  %v2783_v20 = vmax.f32 %v2775_v5, 0.0 }
 0x3ab   : > { %2793 = vst.msk [vmem:[%s4435_s30 + $0x38] sm:$0xff] %vm348_vm0, %v2785_v47 }
 0x3ac   : > { %2791 = vst.msk [vmem:[%s4435_s30 + $0x28] sm:$0xff] %vm348_vm0, %v2783_v20 }
 0x3ad   : > { %3753 = shalt.err (!%p3750_p7)
}
 0x3ae   : > { %s3754_s16 = scalar_lea.hbm %s4456_s10, 1024  ;;  %s3758_s30 = scalar_lea.hbm %s4515_s7, 2048 }
 0x3af   : > { %p3755_p9 = scmp.ne.s32.totalorder %s4456_s10, %s3754_s16  ;;  %p3759_p5 = scmp.lt.u32.totalorder %s4456_s10, %s4515_s7 }
 0x3b0   : > { %p3760_p11 = scmp.lt.u32.totalorder %s3758_s30, %s3754_s16  ;;  %p3762_p4 = scmp.lt.u32.totalorder %s3754_s16, %s4456_s10 }
 0x3b1   : > { %p3756_p2 = pnand %p3755_p9, %p3953_p12 }
 0x3b2   : > { %p3761_p1 = por %p3760_p11, %p3759_p5 }
 0x3b3   : > { %p3757_p0 = pneg %p3756_p2 }
 0x3b4   : > { %p3763_p6 = por %p3762_p4, %p3761_p1 }
 0x3b6   : > { %p3764_p8 = pnand %p3763_p6, %p3757_p0 }
 0x3b8   : > { %3767 = shalt.err (!%p3764_p8)
}
 0x3b9   : > { %s3820_s21 = smov 128   ;;  %s3821_s11 = smov 8  }
 0x3ba   : > { %3522 = dma.vmem_to_hbm [thread:$0]  (%p3953_p12), %s4458_s29, 1024, %s4456_s10, %s2795_s28, %s3820_s21, %s3820_s21, %s3821_s11  }
 0x3bb PF: > { %s2823_s22 = sand.u32 1, %s3798_s24   ;;  %p4540_p10 = scmp.ne.s32.totalorder %s4520_s8, 0 }
 0x3bc   : > { %p4541_p13 = scmp.ge.s32.totalorder %s3810_s27, 2  ;;  %s2824_s20 = scalar_lea.sflag [#allocation5], %s2823_s22 }
 0x3be   : > { %p3533_p3 = pnand %p4541_p13, %p4540_p10 }
 0x3c0   : > { %3793 = dma.done.wait (!%p3533_p3), %s2824_s20, 1024  }
 0x3c1   : > { %3795 = vsyncadd (!%p3533_p3), %s2824_s20, 4294966272  ;;  %p21_p7 = scmp.ge.s32.totalorder %s3918_s13, 4   ;;  %s4542_s24 = smov %s3802_s25 }
 0x3c2   : > { %s4543_s25 = smov %s3806_s26  ;;  %s4544_s26 = smov %s3949_s18 }
 0x3c3   : > { %s4545_s27 = smov %s3918_s13  ;;  %23 = sbr.rel (!%p21_p7) target bundleno = 6 (0x6), region = 100 }
 0x3ca   :  { %2829 = vsyncpa [#allocation4], 1 }
 0x3cb   :  { %2831 = vsyncpa [#allocation4 + $0x1], 1 }
 0x3cc   :  { %2832 = vsyncpa [#allocation7], 1 }
 0x3cd   :  { %2833 = vsyncpa [#allocation5], 1 }
 0x3ce   :  { %2835 = vsyncpa [#allocation5 + $0x1], 1 }

</bundles_post_ra>
